<compile_context>
chip_gen: v7x
topology: tpu7x:2x2x1
jax: 0.10.0
libtpu: 0.0.40
codegen_flags: <defaults>
</compile_context>

<pallas_src>
import functools

import jax
import jax.numpy as jnp
import numpy as np
from jax.experimental import pallas as pl
from jax.experimental.pallas import tpu as pltpu


def round_up(x, m):
    return (x + m - 1) // m * m


def _vmem_budget_bytes():
    """Physical VMEM of the current chip minus headroom for compiler scratch."""
    try:
        cap = int(pltpu.get_tpu_info().vmem_capacity_bytes)
    except Exception:
        cap = 64 << 20                     # conservative (v7x-sized) fallback
    return max(cap - (8 << 20), 24 << 20)  # leave headroom, never go below 24 MiB


def _pick_unroll(tc):
    """Largest divisor of tc that is <= 8 (so fori_loop unroll needs no remainder)."""
    if tc <= 8:
        return tc
    for d in (8, 7, 6, 5, 4, 3, 2):
        if tc % d == 0:
            return d
    return 1


# ---------------------------------------------------------------------------
# GRU layer kernel: grid = (batch_blocks, seq_chunks).
# PyTorch gate order [r, z, n] (each gate padded to Hp lanes):
#   r = sigmoid(W_ir x + b_ir + W_hr h + b_hr)
#   z = sigmoid(W_iz x + b_iz + W_hz h + b_hz)
#   n = tanh  (W_in x + b_in + r * (W_hn h + b_hn))
#   h' = (1 - z) * n + z * h  ==  n + z * (h - n)
# b_ir+b_hr and b_iz+b_hz are pre-summed into the hoisted input projection; only
# b_hn is carried on the recurrent side (it is gated by r) and added to the n slice.
# The hidden state is carried across chunks in the resident hn output block.
# ---------------------------------------------------------------------------
def gru_layer_kernel(x_ref, wih_ref, whh_ref, bih_ref, bhhn_ref, h0_ref,
                     out_ref, hn_ref, gi_ref, *, seq_len, unroll, guard_tail):
    chunk = pl.program_id(1)
    tc, bb, dinp = x_ref.shape
    hp = hn_ref.shape[1]

    # First chunk of each batch block: seed the resident hidden-state block.
    @pl.when(chunk == 0)
    def _():
        hn_ref[...] = h0_ref[...]

    # Hoisted input projection over the whole chunk: one large MXU matmul.
    x_blk = x_ref[...].reshape(tc * bb, dinp)
    gi_ref[...] = (jnp.dot(x_blk.astype(wih_ref.dtype), wih_ref[...],
                           preferred_element_type=jnp.float32)
                   + bih_ref[...])

    def step(t, h_prev):
        i = pl.multiple_of(t * bb, bb)
        gi = gi_ref[pl.ds(i, bb), :]                               # (bb, 3*hp)
        gh = jnp.dot(h_prev.astype(whh_ref.dtype), whh_ref[...],
                     preferred_element_type=jnp.float32)           # (bb, 3*hp)
        r = jax.nn.sigmoid(gi[:, :hp] + gh[:, :hp])
        z = jax.nn.sigmoid(gi[:, hp:2 * hp] + gh[:, hp:2 * hp])
        n = jnp.tanh(gi[:, 2 * hp:] + r * (gh[:, 2 * hp:] + bhhn_ref[...]))
        h_new = n + z * (h_prev - n)
        if guard_tail:  # padded tail timesteps must not advance the hidden state
            h_new = jnp.where(chunk * tc + t < seq_len, h_new, h_prev)
        out_ref[t] = h_new                                         # lane-dense store
        return h_new

    hn_ref[...] = jax.lax.fori_loop(0, tc, step, hn_ref[...], unroll=unroll)


def gru_layer(x_p, lp, h0_p, seq_len, time_chunk, batch_block, vmem_limit):
    """One GRU layer on padded data.
    x_p: (Sp, Bp, Dinp) f32; lp: packed/padded weights; h0_p: (Bp, Hp) f32."""
    sp, bp, dinp = x_p.shape
    hp = h0_p.shape[1]
    nb = bp // batch_block
    nc = sp // time_chunk

    kernel = functools.partial(
        gru_layer_kernel,
        seq_len=seq_len,
        unroll=_pick_unroll(time_chunk),
        guard_tail=(sp != seq_len))

    out, hn = pl.pallas_call(
        kernel,
        out_shape=(jax.ShapeDtypeStruct((sp, bp, hp), jnp.float32),
                   jax.ShapeDtypeStruct((bp, hp), jnp.float32)),
        grid=(nb, nc),
        in_specs=[
            pl.BlockSpec((time_chunk, batch_block, dinp), lambda b, c: (c, b, 0)),
            pl.BlockSpec((dinp, 3 * hp), lambda b, c: (0, 0)),   # resident weights
            pl.BlockSpec((hp, 3 * hp), lambda b, c: (0, 0)),
            pl.BlockSpec((1, 3 * hp), lambda b, c: (0, 0)),
            pl.BlockSpec((1, hp), lambda b, c: (0, 0)),
            pl.BlockSpec((batch_block, hp), lambda b, c: (b, 0)),
        ],
        out_specs=(
            pl.BlockSpec((time_chunk, batch_block, hp), lambda b, c: (c, b, 0)),
            pl.BlockSpec((batch_block, hp), lambda b, c: (b, 0)),  # carried h
        ),
        scratch_shapes=[pltpu.VMEM((time_chunk * batch_block, 3 * hp),
                                   jnp.float32)],                  # gi for one chunk
        compiler_params=pltpu.CompilerParams(
            dimension_semantics=("parallel", "arbitrary"),
            vmem_limit_bytes=int(vmem_limit)),
    )(x_p, lp["wih"], lp["whh"], lp["bih"], lp["bhhn"], h0_p)
    return out, hn


# ---------------------------------------------------------------------------
# Decoder linear: tiled matmul, vocab axis OUTER / row axis INNER so the big
# (Hp, Vp) weight is streamed exactly once; lane-dense output tiles.
# ---------------------------------------------------------------------------
def decoder_kernel(x_ref, w_ref, b_ref, o_ref):
    o_ref[...] = (jnp.dot(x_ref[...].astype(w_ref.dtype), w_ref[...],
                          preferred_element_type=jnp.float32)
                  + b_ref[...]).astype(o_ref.dtype)


def decoder_linear(x, w_t_p, b_p, vmem_limit):
    # x: (M, Hp) f32; w_t_p: (Hp, Vp) (possibly bf16); b_p: (1, Vp) f32
    m, hp = x.shape
    vp = w_t_p.shape[1]
    tm = round_up(m, 8) if m <= 512 else 512
    mp = round_up(m, tm)
    tv = vp if vp <= 1024 else 1024        # Vp is a multiple of tv by construction
    if mp != m:
        x = jnp.zeros((mp, hp), x.dtype).at[:m].set(x)

    out = pl.pallas_call(
        decoder_kernel,
        out_shape=jax.ShapeDtypeStruct((mp, vp), jnp.float32),
        grid=(vp // tv, mp // tm),         # j (vocab) outer, i (rows) inner
        in_specs=[pl.BlockSpec((tm, hp), lambda j, i: (i, 0)),
                  pl.BlockSpec((hp, tv), lambda j, i: (0, j)),
                  pl.BlockSpec((1, tv), lambda j, i: (0, j))],
        out_specs=pl.BlockSpec((tm, tv), lambda j, i: (i, j)),
        compiler_params=pltpu.CompilerParams(
            dimension_semantics=("parallel", "parallel"),
            vmem_limit_bytes=int(vmem_limit)),
    )(x, w_t_p, b_p)
    return out


# ---------------------------------------------------------------------------
# One-time parameter packing: transpose, pad gates to 128 lanes, fold biases,
# cast matmul operands to the MXU dtype (bf16 by default for v6e/v7x).
# ---------------------------------------------------------------------------
def prepare_params(params, batch, mxu_dtype=jnp.bfloat16):
    gru = params["gru"]
    dec_w, dec_b = params["dec_w"], params["dec_b"]
    H = gru[0][1].shape[1]                  # w_hh: (3H, H)
    Hp = round_up(H, 128)
    Bp = round_up(batch, 8)

    layers = []
    for (w_ih, w_hh, b_ih, b_hh) in gru:
        Din = w_ih.shape[1]
        Dinp = round_up(Din, 128)
        wih_t = w_ih.T                      # (Din, 3H)
        whh_t = w_hh.T                      # (H, 3H)
        wih_p = jnp.zeros((Dinp, 3, Hp), jnp.float32)
        whh_p = jnp.zeros((Hp, 3, Hp), jnp.float32)
        for g in range(3):
            wih_p = wih_p.at[:Din, g, :H].set(wih_t[:, g * H:(g + 1) * H])
            whh_p = whh_p.at[:H, g, :H].set(whh_t[:, g * H:(g + 1) * H])
        bih_p = jnp.zeros((3, Hp), jnp.float32)
        bih_p = bih_p.at[0, :H].set(b_ih[0:H] + b_hh[0:H])           # r: fold b_hr
        bih_p = bih_p.at[1, :H].set(b_ih[H:2 * H] + b_hh[H:2 * H])   # z: fold b_hz
        bih_p = bih_p.at[2, :H].set(b_ih[2 * H:3 * H])               # n: b_in only
        bhhn_p = jnp.zeros((1, Hp), jnp.float32).at[0, :H].set(b_hh[2 * H:3 * H])
        layers.append(dict(
            wih=wih_p.reshape(Dinp, 3 * Hp).astype(mxu_dtype),
            whh=whh_p.reshape(Hp, 3 * Hp).astype(mxu_dtype),
            bih=bih_p.reshape(1, 3 * Hp),
            bhhn=bhhn_p,
            Dinp=Dinp,
        ))

    V = dec_w.shape[0]
    Vp = round_up(V, 128)
    if Vp > 1024:
        Vp = round_up(Vp, 1024)
    dec_wt = (jnp.zeros((Hp, Vp), jnp.float32)
              .at[:H, :V].set(dec_w.T)).astype(mxu_dtype)
    dec_bp = jnp.zeros((1, Vp), jnp.float32).at[0, :V].set(dec_b)

    return dict(emb=params["emb"], layers=layers, dec_wt=dec_wt, dec_b=dec_bp,
                H=H, Hp=Hp, Bp=Bp, V=V, Vp=Vp,
                mxu_bytes=jnp.dtype(mxu_dtype).itemsize)


# ---------------------------------------------------------------------------
# Full model forward (glue in plain JAX, hot loops in Pallas).
# ---------------------------------------------------------------------------
def rnn_model_forward(prep, tokens, hidden):
    S, B = tokens.shape
    H, Hp, Bp, V = prep["H"], prep["Hp"], prep["Bp"], prep["V"]
    layers = prep["layers"]
    Ep = layers[0]["Dinp"]

    # Embedding lookup kept as an XLA gather (glue). Dropouts are identity (eval).
    emb = jnp.take(prep["emb"], tokens, axis=0)             # (S, B, E)
    E = emb.shape[-1]

    # ---- shared chunking plan for all GRU layers (derived from real VMEM size) ----
    budget = _vmem_budget_bytes()
    dmax = max(Ep, Hp)
    weight_res = 2 * (dmax * 3 * Hp + Hp * 3 * Hp) * prep["mxu_bytes"]  # db'd weights
    batch_block = Bp // 2 if (Bp % 16 == 0) else Bp          # 2 blocks -> 2 TCs on v7x
    per_t = Bp * 4 * (2 * dmax + 2 * Hp + 3 * Hp)            # x/out double-buf + gi
    avail = max(budget - weight_res - (4 << 20), 1 << 20)
    Tc = int(max(1, min(S, avail // per_t)))
    Sp = round_up(S, Tc)

    x = jnp.zeros((Sp, Bp, Ep), jnp.float32).at[:S, :B, :E].set(emb)

    h_out = []
    for l, lp in enumerate(layers):
        h0 = jnp.zeros((Bp, Hp), jnp.float32).at[:B, :H].set(hidden[l])
        x, hn = gru_layer(x, lp, h0, S, Tc, batch_block, budget)  # x: (Sp, Bp, Hp)
        h_out.append(hn[:B, :H])

    # ---- decoder: either feed the padded slab directly (small pad ratio) or strip ----
    pad_ratio = (Sp * Bp) / float(S * B)
    if pad_ratio <= 1.3:
        flat = x.reshape(Sp * Bp, Hp)
        logits = decoder_linear(flat, prep["dec_wt"], prep["dec_b"], budget)
        logits = logits[:Sp * Bp].reshape(Sp, Bp, -1)[:S, :B, :V].reshape(S * B, V)
    else:
        flat = x[:S, :B, :].reshape(S * B, Hp)               # x.view(-1, nhid)
        logits = decoder_linear(flat, prep["dec_wt"], prep["dec_b"], budget)
        logits = logits[:S * B, :V]
    return logits, jnp.stack(h_out, axis=0)


# ---------------------------------------------------------------------------
# Pure-JAX reference (for correctness checking).
# ---------------------------------------------------------------------------
def gru_layer_ref(x, w_ih, w_hh, b_ih, b_hh, h0):
    H = h0.shape[-1]

    def step(h, x_t):
        gi = x_t @ w_ih.T + b_ih
        gh = h @ w_hh.T + b_hh
        r = jax.nn.sigmoid(gi[:, :H] + gh[:, :H])
        z = jax.nn.sigmoid(gi[:, H:2 * H] + gh[:, H:2 * H])
        n = jnp.tanh(gi[:, 2 * H:] + r * gh[:, 2 * H:])
        h_new = (1.0 - z) * n + z * h
        return h_new, h_new

    h_last, ys = jax.lax.scan(step, h0, x)
    return ys, h_last


def rnn_model_ref(params, tokens, hidden):
    x = jnp.take(params["emb"], tokens, axis=0)
    h_out = []
    for l, (w_ih, w_hh, b_ih, b_hh) in enumerate(params["gru"]):
        x, h_n = gru_layer_ref(x, w_ih, w_hh, b_ih, b_hh, hidden[l])
        h_out.append(h_n)
    S, B, H = x.shape
    flat = x.reshape(S * B, H)
    logits = flat @ params["dec_w"].T + params["dec_b"]
    return logits, jnp.stack(h_out, axis=0)


if __name__ == "__main__":
    # Small shapes consistent with the module: GRU(emsize, nhid, nlayers)
    ntoken, emsize, nhid, nlayers = 100, 32, 32, 2
    seq_len, batch = 8, 2

    key = jax.random.PRNGKey(0)
    keys = jax.random.split(key, 4 + 4 * nlayers)

    scale = 1.0 / np.sqrt(nhid)
    gru_params = []
    for l in range(nlayers):
        in_dim = emsize if l == 0 else nhid
        k0, k1, k2, k3 = keys[4 + 4 * l: 8 + 4 * l]
        gru_params.append((
            jax.random.uniform(k0, (3 * nhid, in_dim), jnp.float32, -scale, scale),
            jax.random.uniform(k1, (3 * nhid, nhid), jnp.float32, -scale, scale),
            jax.random.uniform(k2, (3 * nhid,), jnp.float32, -scale, scale),
            jax.random.uniform(k3, (3 * nhid,), jnp.float32, -scale, scale),
        ))

    params = {
        "emb": jax.random.normal(keys[0], (ntoken, emsize), jnp.float32) * 0.1,
        "gru": gru_params,
        "dec_w": jax.random.normal(keys[1], (ntoken, nhid), jnp.float32)
                 * np.sqrt(2.0 / (ntoken + nhid)),   # xavier_normal
        "dec_b": jnp.zeros((ntoken,), jnp.float32),
    }

    tokens = jax.random.randint(keys[2], (seq_len, batch), 0, ntoken, jnp.int32)
    hidden = jax.random.normal(keys[3], (nlayers, batch, nhid), jnp.float32) * 0.1

    ref_logits, ref_h_n = rnn_model_ref(params, tokens, hidden)

    # --- f32 MXU path: tight check against the f32 reference ---
    prep_f32 = prepare_params(params, batch, mxu_dtype=jnp.float32)
    logits, h_n = rnn_model_forward(prep_f32, tokens, hidden)
    logits = jax.block_until_ready(logits)
    h_n = jax.block_until_ready(h_n)
    np.testing.assert_allclose(np.asarray(logits), np.asarray(ref_logits),
                               rtol=1e-4, atol=1e-4)
    np.testing.assert_allclose(np.asarray(h_n), np.asarray(ref_h_n),
                               rtol=1e-4, atol=1e-4)

    # --- bf16 MXU path (default for v6e/v7x): bf16 weights, f32 gates/accum ---
    prep_bf16 = prepare_params(params, batch, mxu_dtype=jnp.bfloat16)
    logits_bf, h_n_bf = rnn_model_forward(prep_bf16, tokens, hidden)
    logits_bf = jax.block_until_ready(logits_bf)
    h_n_bf = jax.block_until_ready(h_n_bf)
    np.testing.assert_allclose(np.asarray(logits_bf), np.asarray(ref_logits),
                               rtol=5e-2, atol=5e-2)
    np.testing.assert_allclose(np.asarray(h_n_bf), np.asarray(ref_h_n),
                               rtol=5e-2, atol=5e-2)

    assert logits.shape == (seq_len * batch, ntoken)
    assert h_n.shape == (nlayers, batch, nhid)
    print("KERNEL_OK")
</pallas_src>

<mosaic_0001>
module attributes {stable_mosaic.version = 11 : i64} {
  func.func @gru_layer_kernel(%arg0: i32, %arg1: i32, %arg2: memref<8x8x128xf32, #tpu.memory_space<vmem>>, %arg3: memref<128x384xf32, #tpu.memory_space<vmem>>, %arg4: memref<128x384xf32, #tpu.memory_space<vmem>>, %arg5: memref<1x384xf32, #tpu.memory_space<vmem>>, %arg6: memref<1x128xf32, #tpu.memory_space<vmem>>, %arg7: memref<8x128xf32, #tpu.memory_space<vmem>>, %arg8: memref<8x8x128xf32, #tpu.memory_space<vmem>>, %arg9: memref<8x128xf32, #tpu.memory_space<vmem>>, %arg10: memref<64x384xf32, #tpu.memory_space<vmem>>) attributes {dimension_semantics = [#tpu.dimension_semantics<parallel>, #tpu.dimension_semantics<arbitrary>], iteration_bounds = array<i64: 1, 1>, scalar_prefetch = 0 : i64, scratch_operands = 1 : i64, tpu.core_type = #tpu.core_type<tc>, window_params = [{transform_indices = @transform_0, window_bounds = array<i64: 8, 8, 128>}, {pipeline_mode = #tpu.pipeline_mode<synchronous>, transform_indices = @transform_1, window_bounds = array<i64: 128, 384>}, {pipeline_mode = #tpu.pipeline_mode<synchronous>, transform_indices = @transform_2, window_bounds = array<i64: 128, 384>}, {pipeline_mode = #tpu.pipeline_mode<synchronous>, transform_indices = @transform_3, window_bounds = array<i64: 1, 384>}, {pipeline_mode = #tpu.pipeline_mode<synchronous>, transform_indices = @transform_4, window_bounds = array<i64: 1, 128>}, {transform_indices = @transform_5, window_bounds = array<i64: 8, 128>}, {transform_indices = @transform_6, window_bounds = array<i64: 8, 8, 128>}, {transform_indices = @transform_7, window_bounds = array<i64: 8, 128>}]} {
    %c0_i32 = arith.constant 0 : i32
    %0 = arith.cmpi eq, %arg1, %c0_i32 : i32
    %1 = arith.extui %0 : i1 to i32
    %c0_i32_0 = arith.constant 0 : i32
    %2 = arith.cmpi ne, %1, %c0_i32_0 : i32
    scf.if %2 {
      %c0_102 = arith.constant 0 : index
      %c0_103 = arith.constant 0 : index
      %309 = vector.load %arg7[%c0_102, %c0_103] : memref<8x128xf32, #tpu.memory_space<vmem>>, vector<8x128xf32>
      %c0_104 = arith.constant 0 : index
      %c0_105 = arith.constant 0 : index
      %310 = vector.load %arg9[%c0_104, %c0_105] : memref<8x128xf32, #tpu.memory_space<vmem>>, vector<8x128xf32>
      tpu.vector_store %arg9[%c0_104, %c0_105], %309 {strides = array<i32>} : memref<8x128xf32, #tpu.memory_space<vmem>>, vector<8x128xf32>,
    } else {
    }
    %c0 = arith.constant 0 : index
    %c0_1 = arith.constant 0 : index
    %c0_2 = arith.constant 0 : index
    %3 = vector.load %arg2[%c0, %c0_1, %c0_2] : memref<8x8x128xf32, #tpu.memory_space<vmem>>, vector<8x8x128xf32>
    %4 = vector.shape_cast %3 : vector<8x8x128xf32> to vector<64x128xf32>
    %c0_3 = arith.constant 0 : index
    %c0_4 = arith.constant 0 : index
    %5 = vector.load %arg3[%c0_3, %c0_4] : memref<128x384xf32, #tpu.memory_space<vmem>>, vector<128x384xf32>
    %cst = arith.constant dense<0.000000e+00> : vector<64x384xf32>
    %6 = tpu.matmul %4, %5, %cst {dimension_numbers = #tpu.dot_dimension_numbers<[1], [0], [0], [1], [0, 0, 1, 1], [], []>} : vector<64x128xf32>, vector<128x384xf32>, vector<64x384xf32> -> vector<64x384xf32>
    %c0_5 = arith.constant 0 : index
    %c0_6 = arith.constant 0 : index
    %7 = vector.load %arg5[%c0_5, %c0_6] : memref<1x384xf32, #tpu.memory_space<vmem>>, vector<1x384xf32>
    %8 = vector.broadcast %7 : vector<1x384xf32> to vector<64x384xf32>
    %9 = arith.addf %6, %8 : vector<64x384xf32>
    %c0_7 = arith.constant 0 : index
    %c0_8 = arith.constant 0 : index
    %10 = vector.load %arg10[%c0_7, %c0_8] : memref<64x384xf32, #tpu.memory_space<vmem>>, vector<64x384xf32>
    tpu.vector_store %arg10[%c0_7, %c0_8], %9 {strides = array<i32>} : memref<64x384xf32, #tpu.memory_space<vmem>>, vector<64x384xf32>,
    %c0_9 = arith.constant 0 : index
    %c0_10 = arith.constant 0 : index
    %11 = vector.load %arg9[%c0_9, %c0_10] : memref<8x128xf32, #tpu.memory_space<vmem>>, vector<8x128xf32>
    %c0_i32_11 = arith.constant 0 : i32
    %c8_i32 = arith.constant 8 : i32
    %12 = arith.muli %c0_i32_11, %c8_i32 : i32
    %13 = tpu.assume_multiple %12, 8 : i32
    %14 = arith.index_cast %13 : i32 to index
    %c0_12 = arith.constant 0 : index
    %15 = vector.load %arg10[%14, %c0_12] : memref<64x384xf32, #tpu.memory_space<vmem>>, vector<8x384xf32>
    %c0_13 = arith.constant 0 : index
    %c0_14 = arith.constant 0 : index
    %16 = vector.load %arg4[%c0_13, %c0_14] : memref<128x384xf32, #tpu.memory_space<vmem>>, vector<128x384xf32>
    %cst_15 = arith.constant dense<0.000000e+00> : vector<8x384xf32>
    %17 = tpu.matmul %11, %16, %cst_15 {dimension_numbers = #tpu.dot_dimension_numbers<[1], [0], [0], [1], [0, 0, 1, 1], [], []>} : vector<8x128xf32>, vector<128x384xf32>, vector<8x384xf32> -> vector<8x384xf32>
    %18 = vector.extract_strided_slice %15 {offsets = [0, 0], sizes = [8, 128], strides = [1, 1]} : vector<8x384xf32> to vector<8x128xf32>
    %19 = vector.extract_strided_slice %17 {offsets = [0, 0], sizes = [8, 128], strides = [1, 1]} : vector<8x384xf32> to vector<8x128xf32>
    %20 = arith.addf %18, %19 : vector<8x128xf32>
    %21 = arith.negf %20 : vector<8x128xf32>
    %22 = math.exp %21 : vector<8x128xf32>
    %cst_16 = arith.constant 1.000000e+00 : f32
    %23 = vector.broadcast %cst_16 : f32 to vector<8x128xf32>
    %24 = arith.addf %23, %22 : vector<8x128xf32>
    %25 = arith.divf %23, %24 : vector<8x128xf32>
    %26 = vector.extract_strided_slice %15 {offsets = [0, 128], sizes = [8, 128], strides = [1, 1]} : vector<8x384xf32> to vector<8x128xf32>
    %27 = vector.extract_strided_slice %17 {offsets = [0, 128], sizes = [8, 128], strides = [1, 1]} : vector<8x384xf32> to vector<8x128xf32>
    %28 = arith.addf %26, %27 : vector<8x128xf32>
    %29 = arith.negf %28 : vector<8x128xf32>
    %30 = math.exp %29 : vector<8x128xf32>
    %cst_17 = arith.constant 1.000000e+00 : f32
    %31 = vector.broadcast %cst_17 : f32 to vector<8x128xf32>
    %32 = arith.addf %31, %30 : vector<8x128xf32>
    %33 = arith.divf %31, %32 : vector<8x128xf32>
    %34 = vector.extract_strided_slice %15 {offsets = [0, 256], sizes = [8, 128], strides = [1, 1]} : vector<8x384xf32> to vector<8x128xf32>
    %35 = vector.extract_strided_slice %17 {offsets = [0, 256], sizes = [8, 128], strides = [1, 1]} : vector<8x384xf32> to vector<8x128xf32>
    %c0_18 = arith.constant 0 : index
    %c0_19 = arith.constant 0 : index
    %36 = vector.load %arg6[%c0_18, %c0_19] : memref<1x128xf32, #tpu.memory_space<vmem>>, vector<1x128xf32>
    %37 = vector.broadcast %36 : vector<1x128xf32> to vector<8x128xf32>
    %38 = arith.addf %35, %37 : vector<8x128xf32>
    %39 = arith.mulf %25, %38 : vector<8x128xf32>
    %40 = arith.addf %34, %39 : vector<8x128xf32>
    %41 = math.tanh %40 : vector<8x128xf32>
    %42 = arith.subf %11, %41 : vector<8x128xf32>
    %43 = arith.mulf %33, %42 : vector<8x128xf32>
    %44 = arith.addf %41, %43 : vector<8x128xf32>
    %45 = arith.index_cast %c0_i32_11 : i32 to index
    %c0_20 = arith.constant 0 : index
    %c0_21 = arith.constant 0 : index
    %46 = vector.load %arg8[%45, %c0_20, %c0_21] : memref<8x8x128xf32, #tpu.memory_space<vmem>>, vector<1x8x128xf32>
    %47 = vector.shape_cast %46 : vector<1x8x128xf32> to vector<8x128xf32>
    %48 = vector.shape_cast %44 : vector<8x128xf32> to vector<1x8x128xf32>
    tpu.vector_store %arg8[%45, %c0_20, %c0_21], %48 {strides = array<i32>} : memref<8x8x128xf32, #tpu.memory_space<vmem>>, vector<1x8x128xf32>,
    %c1_i32 = arith.constant 1 : i32
    %c8_i32_22 = arith.constant 8 : i32
    %49 = arith.muli %c1_i32, %c8_i32_22 : i32
    %50 = tpu.assume_multiple %49, 8 : i32
    %51 = arith.index_cast %50 : i32 to index
    %c0_23 = arith.constant 0 : index
    %52 = vector.load %arg10[%51, %c0_23] : memref<64x384xf32, #tpu.memory_space<vmem>>, vector<8x384xf32>
    %c0_24 = arith.constant 0 : index
    %c0_25 = arith.constant 0 : index
    %53 = vector.load %arg4[%c0_24, %c0_25] : memref<128x384xf32, #tpu.memory_space<vmem>>, vector<128x384xf32>
    %cst_26 = arith.constant dense<0.000000e+00> : vector<8x384xf32>
    %54 = tpu.matmul %44, %53, %cst_26 {dimension_numbers = #tpu.dot_dimension_numbers<[1], [0], [0], [1], [0, 0, 1, 1], [], []>} : vector<8x128xf32>, vector<128x384xf32>, vector<8x384xf32> -> vector<8x384xf32>
    %55 = vector.extract_strided_slice %52 {offsets = [0, 0], sizes = [8, 128], strides = [1, 1]} : vector<8x384xf32> to vector<8x128xf32>
    %56 = vector.extract_strided_slice %54 {offsets = [0, 0], sizes = [8, 128], strides = [1, 1]} : vector<8x384xf32> to vector<8x128xf32>
    %57 = arith.addf %55, %56 : vector<8x128xf32>
    %58 = arith.negf %57 : vector<8x128xf32>
    %59 = math.exp %58 : vector<8x128xf32>
    %cst_27 = arith.constant 1.000000e+00 : f32
    %60 = vector.broadcast %cst_27 : f32 to vector<8x128xf32>
    %61 = arith.addf %60, %59 : vector<8x128xf32>
    %62 = arith.divf %60, %61 : vector<8x128xf32>
    %63 = vector.extract_strided_slice %52 {offsets = [0, 128], sizes = [8, 128], strides = [1, 1]} : vector<8x384xf32> to vector<8x128xf32>
    %64 = vector.extract_strided_slice %54 {offsets = [0, 128], sizes = [8, 128], strides = [1, 1]} : vector<8x384xf32> to vector<8x128xf32>
    %65 = arith.addf %63, %64 : vector<8x128xf32>
    %66 = arith.negf %65 : vector<8x128xf32>
    %67 = math.exp %66 : vector<8x128xf32>
    %cst_28 = arith.constant 1.000000e+00 : f32
    %68 = vector.broadcast %cst_28 : f32 to vector<8x128xf32>
    %69 = arith.addf %68, %67 : vector<8x128xf32>
    %70 = arith.divf %68, %69 : vector<8x128xf32>
    %71 = vector.extract_strided_slice %52 {offsets = [0, 256], sizes = [8, 128], strides = [1, 1]} : vector<8x384xf32> to vector<8x128xf32>
    %72 = vector.extract_strided_slice %54 {offsets = [0, 256], sizes = [8, 128], strides = [1, 1]} : vector<8x384xf32> to vector<8x128xf32>
    %c0_29 = arith.constant 0 : index
    %c0_30 = arith.constant 0 : index
    %73 = vector.load %arg6[%c0_29, %c0_30] : memref<1x128xf32, #tpu.memory_space<vmem>>, vector<1x128xf32>
    %74 = vector.broadcast %73 : vector<1x128xf32> to vector<8x128xf32>
    %75 = arith.addf %72, %74 : vector<8x128xf32>
    %76 = arith.mulf %62, %75 : vector<8x128xf32>
    %77 = arith.addf %71, %76 : vector<8x128xf32>
    %78 = math.tanh %77 : vector<8x128xf32>
    %79 = arith.subf %44, %78 : vector<8x128xf32>
    %80 = arith.mulf %70, %79 : vector<8x128xf32>
    %81 = arith.addf %78, %80 : vector<8x128xf32>
    %82 = arith.index_cast %c1_i32 : i32 to index
    %c0_31 = arith.constant 0 : index
    %c0_32 = arith.constant 0 : index
    %83 = vector.load %arg8[%82, %c0_31, %c0_32] : memref<8x8x128xf32, #tpu.memory_space<vmem>>, vector<1x8x128xf32>
    %84 = vector.shape_cast %83 : vector<1x8x128xf32> to vector<8x128xf32>
    %85 = vector.shape_cast %81 : vector<8x128xf32> to vector<1x8x128xf32>
    tpu.vector_store %arg8[%82, %c0_31, %c0_32], %85 {strides = array<i32>} : memref<8x8x128xf32, #tpu.memory_space<vmem>>, vector<1x8x128xf32>,
    %c2_i32 = arith.constant 2 : i32
    %c8_i32_33 = arith.constant 8 : i32
    %86 = arith.muli %c2_i32, %c8_i32_33 : i32
    %87 = tpu.assume_multiple %86, 8 : i32
    %88 = arith.index_cast %87 : i32 to index
    %c0_34 = arith.constant 0 : index
    %89 = vector.load %arg10[%88, %c0_34] : memref<64x384xf32, #tpu.memory_space<vmem>>, vector<8x384xf32>
    %c0_35 = arith.constant 0 : index
    %c0_36 = arith.constant 0 : index
    %90 = vector.load %arg4[%c0_35, %c0_36] : memref<128x384xf32, #tpu.memory_space<vmem>>, vector<128x384xf32>
    %cst_37 = arith.constant dense<0.000000e+00> : vector<8x384xf32>
    %91 = tpu.matmul %81, %90, %cst_37 {dimension_numbers = #tpu.dot_dimension_numbers<[1], [0], [0], [1], [0, 0, 1, 1], [], []>} : vector<8x128xf32>, vector<128x384xf32>, vector<8x384xf32> -> vector<8x384xf32>
    %92 = vector.extract_strided_slice %89 {offsets = [0, 0], sizes = [8, 128], strides = [1, 1]} : vector<8x384xf32> to vector<8x128xf32>
    %93 = vector.extract_strided_slice %91 {offsets = [0, 0], sizes = [8, 128], strides = [1, 1]} : vector<8x384xf32> to vector<8x128xf32>
    %94 = arith.addf %92, %93 : vector<8x128xf32>
    %95 = arith.negf %94 : vector<8x128xf32>
    %96 = math.exp %95 : vector<8x128xf32>
    %cst_38 = arith.constant 1.000000e+00 : f32
    %97 = vector.broadcast %cst_38 : f32 to vector<8x128xf32>
    %98 = arith.addf %97, %96 : vector<8x128xf32>
    %99 = arith.divf %97, %98 : vector<8x128xf32>
    %100 = vector.extract_strided_slice %89 {offsets = [0, 128], sizes = [8, 128], strides = [1, 1]} : vector<8x384xf32> to vector<8x128xf32>
    %101 = vector.extract_strided_slice %91 {offsets = [0, 128], sizes = [8, 128], strides = [1, 1]} : vector<8x384xf32> to vector<8x128xf32>
    %102 = arith.addf %100, %101 : vector<8x128xf32>
    %103 = arith.negf %102 : vector<8x128xf32>
    %104 = math.exp %103 : vector<8x128xf32>
    %cst_39 = arith.constant 1.000000e+00 : f32
    %105 = vector.broadcast %cst_39 : f32 to vector<8x128xf32>
    %106 = arith.addf %105, %104 : vector<8x128xf32>
    %107 = arith.divf %105, %106 : vector<8x128xf32>
    %108 = vector.extract_strided_slice %89 {offsets = [0, 256], sizes = [8, 128], strides = [1, 1]} : vector<8x384xf32> to vector<8x128xf32>
    %109 = vector.extract_strided_slice %91 {offsets = [0, 256], sizes = [8, 128], strides = [1, 1]} : vector<8x384xf32> to vector<8x128xf32>
    %c0_40 = arith.constant 0 : index
    %c0_41 = arith.constant 0 : index
    %110 = vector.load %arg6[%c0_40, %c0_41] : memref<1x128xf32, #tpu.memory_space<vmem>>, vector<1x128xf32>
    %111 = vector.broadcast %110 : vector<1x128xf32> to vector<8x128xf32>
    %112 = arith.addf %109, %111 : vector<8x128xf32>
    %113 = arith.mulf %99, %112 : vector<8x128xf32>
    %114 = arith.addf %108, %113 : vector<8x128xf32>
    %115 = math.tanh %114 : vector<8x128xf32>
    %116 = arith.subf %81, %115 : vector<8x128xf32>
    %117 = arith.mulf %107, %116 : vector<8x128xf32>
    %118 = arith.addf %115, %117 : vector<8x128xf32>
    %119 = arith.index_cast %c2_i32 : i32 to index
    %c0_42 = arith.constant 0 : index
    %c0_43 = arith.constant 0 : index
    %120 = vector.load %arg8[%119, %c0_42, %c0_43] : memref<8x8x128xf32, #tpu.memory_space<vmem>>, vector<1x8x128xf32>
    %121 = vector.shape_cast %120 : vector<1x8x128xf32> to vector<8x128xf32>
    %122 = vector.shape_cast %118 : vector<8x128xf32> to vector<1x8x128xf32>
    tpu.vector_store %arg8[%119, %c0_42, %c0_43], %122 {strides = array<i32>} : memref<8x8x128xf32, #tpu.memory_space<vmem>>, vector<1x8x128xf32>,
    %c3_i32 = arith.constant 3 : i32
    %c8_i32_44 = arith.constant 8 : i32
    %123 = arith.muli %c3_i32, %c8_i32_44 : i32
    %124 = tpu.assume_multiple %123, 8 : i32
    %125 = arith.index_cast %124 : i32 to index
    %c0_45 = arith.constant 0 : index
    %126 = vector.load %arg10[%125, %c0_45] : memref<64x384xf32, #tpu.memory_space<vmem>>, vector<8x384xf32>
    %c0_46 = arith.constant 0 : index
    %c0_47 = arith.constant 0 : index
    %127 = vector.load %arg4[%c0_46, %c0_47] : memref<128x384xf32, #tpu.memory_space<vmem>>, vector<128x384xf32>
    %cst_48 = arith.constant dense<0.000000e+00> : vector<8x384xf32>
    %128 = tpu.matmul %118, %127, %cst_48 {dimension_numbers = #tpu.dot_dimension_numbers<[1], [0], [0], [1], [0, 0, 1, 1], [], []>} : vector<8x128xf32>, vector<128x384xf32>, vector<8x384xf32> -> vector<8x384xf32>
    %129 = vector.extract_strided_slice %126 {offsets = [0, 0], sizes = [8, 128], strides = [1, 1]} : vector<8x384xf32> to vector<8x128xf32>
    %130 = vector.extract_strided_slice %128 {offsets = [0, 0], sizes = [8, 128], strides = [1, 1]} : vector<8x384xf32> to vector<8x128xf32>
    %131 = arith.addf %129, %130 : vector<8x128xf32>
    %132 = arith.negf %131 : vector<8x128xf32>
    %133 = math.exp %132 : vector<8x128xf32>
    %cst_49 = arith.constant 1.000000e+00 : f32
    %134 = vector.broadcast %cst_49 : f32 to vector<8x128xf32>
    %135 = arith.addf %134, %133 : vector<8x128xf32>
    %136 = arith.divf %134, %135 : vector<8x128xf32>
    %137 = vector.extract_strided_slice %126 {offsets = [0, 128], sizes = [8, 128], strides = [1, 1]} : vector<8x384xf32> to vector<8x128xf32>
    %138 = vector.extract_strided_slice %128 {offsets = [0, 128], sizes = [8, 128], strides = [1, 1]} : vector<8x384xf32> to vector<8x128xf32>
    %139 = arith.addf %137, %138 : vector<8x128xf32>
    %140 = arith.negf %139 : vector<8x128xf32>
    %141 = math.exp %140 : vector<8x128xf32>
    %cst_50 = arith.constant 1.000000e+00 : f32
    %142 = vector.broadcast %cst_50 : f32 to vector<8x128xf32>
    %143 = arith.addf %142, %141 : vector<8x128xf32>
    %144 = arith.divf %142, %143 : vector<8x128xf32>
    %145 = vector.extract_strided_slice %126 {offsets = [0, 256], sizes = [8, 128], strides = [1, 1]} : vector<8x384xf32> to vector<8x128xf32>
    %146 = vector.extract_strided_slice %128 {offsets = [0, 256], sizes = [8, 128], strides = [1, 1]} : vector<8x384xf32> to vector<8x128xf32>
    %c0_51 = arith.constant 0 : index
    %c0_52 = arith.constant 0 : index
    %147 = vector.load %arg6[%c0_51, %c0_52] : memref<1x128xf32, #tpu.memory_space<vmem>>, vector<1x128xf32>
    %148 = vector.broadcast %147 : vector<1x128xf32> to vector<8x128xf32>
    %149 = arith.addf %146, %148 : vector<8x128xf32>
    %150 = arith.mulf %136, %149 : vector<8x128xf32>
    %151 = arith.addf %145, %150 : vector<8x128xf32>
    %152 = math.tanh %151 : vector<8x128xf32>
    %153 = arith.subf %118, %152 : vector<8x128xf32>
    %154 = arith.mulf %144, %153 : vector<8x128xf32>
    %155 = arith.addf %152, %154 : vector<8x128xf32>
    %156 = arith.index_cast %c3_i32 : i32 to index
    %c0_53 = arith.constant 0 : index
    %c0_54 = arith.constant 0 : index
    %157 = vector.load %arg8[%156, %c0_53, %c0_54] : memref<8x8x128xf32, #tpu.memory_space<vmem>>, vector<1x8x128xf32>
    %158 = vector.shape_cast %157 : vector<1x8x128xf32> to vector<8x128xf32>
    %159 = vector.shape_cast %155 : vector<8x128xf32> to vector<1x8x128xf32>
    tpu.vector_store %arg8[%156, %c0_53, %c0_54], %159 {strides = array<i32>} : memref<8x8x128xf32, #tpu.memory_space<vmem>>, vector<1x8x128xf32>,
    %c4_i32 = arith.constant 4 : i32
    %c8_i32_55 = arith.constant 8 : i32
    %160 = arith.muli %c4_i32, %c8_i32_55 : i32
    %161 = tpu.assume_multiple %160, 8 : i32
    %162 = arith.index_cast %161 : i32 to index
    %c0_56 = arith.constant 0 : index
    %163 = vector.load %arg10[%162, %c0_56] : memref<64x384xf32, #tpu.memory_space<vmem>>, vector<8x384xf32>
    %c0_57 = arith.constant 0 : index
    %c0_58 = arith.constant 0 : index
    %164 = vector.load %arg4[%c0_57, %c0_58] : memref<128x384xf32, #tpu.memory_space<vmem>>, vector<128x384xf32>
    %cst_59 = arith.constant dense<0.000000e+00> : vector<8x384xf32>
    %165 = tpu.matmul %155, %164, %cst_59 {dimension_numbers = #tpu.dot_dimension_numbers<[1], [0], [0], [1], [0, 0, 1, 1], [], []>} : vector<8x128xf32>, vector<128x384xf32>, vector<8x384xf32> -> vector<8x384xf32>
    %166 = vector.extract_strided_slice %163 {offsets = [0, 0], sizes = [8, 128], strides = [1, 1]} : vector<8x384xf32> to vector<8x128xf32>
    %167 = vector.extract_strided_slice %165 {offsets = [0, 0], sizes = [8, 128], strides = [1, 1]} : vector<8x384xf32> to vector<8x128xf32>
    %168 = arith.addf %166, %167 : vector<8x128xf32>
    %169 = arith.negf %168 : vector<8x128xf32>
    %170 = math.exp %169 : vector<8x128xf32>
    %cst_60 = arith.constant 1.000000e+00 : f32
    %171 = vector.broadcast %cst_60 : f32 to vector<8x128xf32>
    %172 = arith.addf %171, %170 : vector<8x128xf32>
    %173 = arith.divf %171, %172 : vector<8x128xf32>
    %174 = vector.extract_strided_slice %163 {offsets = [0, 128], sizes = [8, 128], strides = [1, 1]} : vector<8x384xf32> to vector<8x128xf32>
    %175 = vector.extract_strided_slice %165 {offsets = [0, 128], sizes = [8, 128], strides = [1, 1]} : vector<8x384xf32> to vector<8x128xf32>
    %176 = arith.addf %174, %175 : vector<8x128xf32>
    %177 = arith.negf %176 : vector<8x128xf32>
    %178 = math.exp %177 : vector<8x128xf32>
    %cst_61 = arith.constant 1.000000e+00 : f32
    %179 = vector.broadcast %cst_61 : f32 to vector<8x128xf32>
    %180 = arith.addf %179, %178 : vector<8x128xf32>
    %181 = arith.divf %179, %180 : vector<8x128xf32>
    %182 = vector.extract_strided_slice %163 {offsets = [0, 256], sizes = [8, 128], strides = [1, 1]} : vector<8x384xf32> to vector<8x128xf32>
    %183 = vector.extract_strided_slice %165 {offsets = [0, 256], sizes = [8, 128], strides = [1, 1]} : vector<8x384xf32> to vector<8x128xf32>
    %c0_62 = arith.constant 0 : index
    %c0_63 = arith.constant 0 : index
    %184 = vector.load %arg6[%c0_62, %c0_63] : memref<1x128xf32, #tpu.memory_space<vmem>>, vector<1x128xf32>
    %185 = vector.broadcast %184 : vector<1x128xf32> to vector<8x128xf32>
    %186 = arith.addf %183, %185 : vector<8x128xf32>
    %187 = arith.mulf %173, %186 : vector<8x128xf32>
    %188 = arith.addf %182, %187 : vector<8x128xf32>
    %189 = math.tanh %188 : vector<8x128xf32>
    %190 = arith.subf %155, %189 : vector<8x128xf32>
    %191 = arith.mulf %181, %190 : vector<8x128xf32>
    %192 = arith.addf %189, %191 : vector<8x128xf32>
    %193 = arith.index_cast %c4_i32 : i32 to index
    %c0_64 = arith.constant 0 : index
    %c0_65 = arith.constant 0 : index
    %194 = vector.load %arg8[%193, %c0_64, %c0_65] : memref<8x8x128xf32, #tpu.memory_space<vmem>>, vector<1x8x128xf32>
    %195 = vector.shape_cast %194 : vector<1x8x128xf32> to vector<8x128xf32>
    %196 = vector.shape_cast %192 : vector<8x128xf32> to vector<1x8x128xf32>
    tpu.vector_store %arg8[%193, %c0_64, %c0_65], %196 {strides = array<i32>} : memref<8x8x128xf32, #tpu.memory_space<vmem>>, vector<1x8x128xf32>,
    %c5_i32 = arith.constant 5 : i32
    %c8_i32_66 = arith.constant 8 : i32
    %197 = arith.muli %c5_i32, %c8_i32_66 : i32
    %198 = tpu.assume_multiple %197, 8 : i32
    %199 = arith.index_cast %198 : i32 to index
    %c0_67 = arith.constant 0 : index
    %200 = vector.load %arg10[%199, %c0_67] : memref<64x384xf32, #tpu.memory_space<vmem>>, vector<8x384xf32>
    %c0_68 = arith.constant 0 : index
    %c0_69 = arith.constant 0 : index
    %201 = vector.load %arg4[%c0_68, %c0_69] : memref<128x384xf32, #tpu.memory_space<vmem>>, vector<128x384xf32>
    %cst_70 = arith.constant dense<0.000000e+00> : vector<8x384xf32>
    %202 = tpu.matmul %192, %201, %cst_70 {dimension_numbers = #tpu.dot_dimension_numbers<[1], [0], [0], [1], [0, 0, 1, 1], [], []>} : vector<8x128xf32>, vector<128x384xf32>, vector<8x384xf32> -> vector<8x384xf32>
    %203 = vector.extract_strided_slice %200 {offsets = [0, 0], sizes = [8, 128], strides = [1, 1]} : vector<8x384xf32> to vector<8x128xf32>
    %204 = vector.extract_strided_slice %202 {offsets = [0, 0], sizes = [8, 128], strides = [1, 1]} : vector<8x384xf32> to vector<8x128xf32>
    %205 = arith.addf %203, %204 : vector<8x128xf32>
    %206 = arith.negf %205 : vector<8x128xf32>
    %207 = math.exp %206 : vector<8x128xf32>
    %cst_71 = arith.constant 1.000000e+00 : f32
    %208 = vector.broadcast %cst_71 : f32 to vector<8x128xf32>
    %209 = arith.addf %208, %207 : vector<8x128xf32>
    %210 = arith.divf %208, %209 : vector<8x128xf32>
    %211 = vector.extract_strided_slice %200 {offsets = [0, 128], sizes = [8, 128], strides = [1, 1]} : vector<8x384xf32> to vector<8x128xf32>
    %212 = vector.extract_strided_slice %202 {offsets = [0, 128], sizes = [8, 128], strides = [1, 1]} : vector<8x384xf32> to vector<8x128xf32>
    %213 = arith.addf %211, %212 : vector<8x128xf32>
    %214 = arith.negf %213 : vector<8x128xf32>
    %215 = math.exp %214 : vector<8x128xf32>
    %cst_72 = arith.constant 1.000000e+00 : f32
    %216 = vector.broadcast %cst_72 : f32 to vector<8x128xf32>
    %217 = arith.addf %216, %215 : vector<8x128xf32>
    %218 = arith.divf %216, %217 : vector<8x128xf32>
    %219 = vector.extract_strided_slice %200 {offsets = [0, 256], sizes = [8, 128], strides = [1, 1]} : vector<8x384xf32> to vector<8x128xf32>
    %220 = vector.extract_strided_slice %202 {offsets = [0, 256], sizes = [8, 128], strides = [1, 1]} : vector<8x384xf32> to vector<8x128xf32>
    %c0_73 = arith.constant 0 : index
    %c0_74 = arith.constant 0 : index
    %221 = vector.load %arg6[%c0_73, %c0_74] : memref<1x128xf32, #tpu.memory_space<vmem>>, vector<1x128xf32>
    %222 = vector.broadcast %221 : vector<1x128xf32> to vector<8x128xf32>
    %223 = arith.addf %220, %222 : vector<8x128xf32>
    %224 = arith.mulf %210, %223 : vector<8x128xf32>
    %225 = arith.addf %219, %224 : vector<8x128xf32>
    %226 = math.tanh %225 : vector<8x128xf32>
    %227 = arith.subf %192, %226 : vector<8x128xf32>
    %228 = arith.mulf %218, %227 : vector<8x128xf32>
    %229 = arith.addf %226, %228 : vector<8x128xf32>
    %230 = arith.index_cast %c5_i32 : i32 to index
    %c0_75 = arith.constant 0 : index
    %c0_76 = arith.constant 0 : index
    %231 = vector.load %arg8[%230, %c0_75, %c0_76] : memref<8x8x128xf32, #tpu.memory_space<vmem>>, vector<1x8x128xf32>
    %232 = vector.shape_cast %231 : vector<1x8x128xf32> to vector<8x128xf32>
    %233 = vector.shape_cast %229 : vector<8x128xf32> to vector<1x8x128xf32>
    tpu.vector_store %arg8[%230, %c0_75, %c0_76], %233 {strides = array<i32>} : memref<8x8x128xf32, #tpu.memory_space<vmem>>, vector<1x8x128xf32>,
    %c6_i32 = arith.constant 6 : i32
    %c8_i32_77 = arith.constant 8 : i32
    %234 = arith.muli %c6_i32, %c8_i32_77 : i32
    %235 = tpu.assume_multiple %234, 8 : i32
    %236 = arith.index_cast %235 : i32 to index
    %c0_78 = arith.constant 0 : index
    %237 = vector.load %arg10[%236, %c0_78] : memref<64x384xf32, #tpu.memory_space<vmem>>, vector<8x384xf32>
    %c0_79 = arith.constant 0 : index
    %c0_80 = arith.constant 0 : index
    %238 = vector.load %arg4[%c0_79, %c0_80] : memref<128x384xf32, #tpu.memory_space<vmem>>, vector<128x384xf32>
    %cst_81 = arith.constant dense<0.000000e+00> : vector<8x384xf32>
    %239 = tpu.matmul %229, %238, %cst_81 {dimension_numbers = #tpu.dot_dimension_numbers<[1], [0], [0], [1], [0, 0, 1, 1], [], []>} : vector<8x128xf32>, vector<128x384xf32>, vector<8x384xf32> -> vector<8x384xf32>
    %240 = vector.extract_strided_slice %237 {offsets = [0, 0], sizes = [8, 128], strides = [1, 1]} : vector<8x384xf32> to vector<8x128xf32>
    %241 = vector.extract_strided_slice %239 {offsets = [0, 0], sizes = [8, 128], strides = [1, 1]} : vector<8x384xf32> to vector<8x128xf32>
    %242 = arith.addf %240, %241 : vector<8x128xf32>
    %243 = arith.negf %242 : vector<8x128xf32>
    %244 = math.exp %243 : vector<8x128xf32>
    %cst_82 = arith.constant 1.000000e+00 : f32
    %245 = vector.broadcast %cst_82 : f32 to vector<8x128xf32>
    %246 = arith.addf %245, %244 : vector<8x128xf32>
    %247 = arith.divf %245, %246 : vector<8x128xf32>
    %248 = vector.extract_strided_slice %237 {offsets = [0, 128], sizes = [8, 128], strides = [1, 1]} : vector<8x384xf32> to vector<8x128xf32>
    %249 = vector.extract_strided_slice %239 {offsets = [0, 128], sizes = [8, 128], strides = [1, 1]} : vector<8x384xf32> to vector<8x128xf32>
    %250 = arith.addf %248, %249 : vector<8x128xf32>
    %251 = arith.negf %250 : vector<8x128xf32>
    %252 = math.exp %251 : vector<8x128xf32>
    %cst_83 = arith.constant 1.000000e+00 : f32
    %253 = vector.broadcast %cst_83 : f32 to vector<8x128xf32>
    %254 = arith.addf %253, %252 : vector<8x128xf32>
    %255 = arith.divf %253, %254 : vector<8x128xf32>
    %256 = vector.extract_strided_slice %237 {offsets = [0, 256], sizes = [8, 128], strides = [1, 1]} : vector<8x384xf32> to vector<8x128xf32>
    %257 = vector.extract_strided_slice %239 {offsets = [0, 256], sizes = [8, 128], strides = [1, 1]} : vector<8x384xf32> to vector<8x128xf32>
    %c0_84 = arith.constant 0 : index
    %c0_85 = arith.constant 0 : index
    %258 = vector.load %arg6[%c0_84, %c0_85] : memref<1x128xf32, #tpu.memory_space<vmem>>, vector<1x128xf32>
    %259 = vector.broadcast %258 : vector<1x128xf32> to vector<8x128xf32>
    %260 = arith.addf %257, %259 : vector<8x128xf32>
    %261 = arith.mulf %247, %260 : vector<8x128xf32>
    %262 = arith.addf %256, %261 : vector<8x128xf32>
    %263 = math.tanh %262 : vector<8x128xf32>
    %264 = arith.subf %229, %263 : vector<8x128xf32>
    %265 = arith.mulf %255, %264 : vector<8x128xf32>
    %266 = arith.addf %263, %265 : vector<8x128xf32>
    %267 = arith.index_cast %c6_i32 : i32 to index
    %c0_86 = arith.constant 0 : index
    %c0_87 = arith.constant 0 : index
    %268 = vector.load %arg8[%267, %c0_86, %c0_87] : memref<8x8x128xf32, #tpu.memory_space<vmem>>, vector<1x8x128xf32>
    %269 = vector.shape_cast %268 : vector<1x8x128xf32> to vector<8x128xf32>
    %270 = vector.shape_cast %266 : vector<8x128xf32> to vector<1x8x128xf32>
    tpu.vector_store %arg8[%267, %c0_86, %c0_87], %270 {strides = array<i32>} : memref<8x8x128xf32, #tpu.memory_space<vmem>>, vector<1x8x128xf32>,
    %c7_i32 = arith.constant 7 : i32
    %c8_i32_88 = arith.constant 8 : i32
    %271 = arith.muli %c7_i32, %c8_i32_88 : i32
    %272 = tpu.assume_multiple %271, 8 : i32
    %273 = arith.index_cast %272 : i32 to index
    %c0_89 = arith.constant 0 : index
    %274 = vector.load %arg10[%273, %c0_89] : memref<64x384xf32, #tpu.memory_space<vmem>>, vector<8x384xf32>
    %c0_90 = arith.constant 0 : index
    %c0_91 = arith.constant 0 : index
    %275 = vector.load %arg4[%c0_90, %c0_91] : memref<128x384xf32, #tpu.memory_space<vmem>>, vector<128x384xf32>
    %cst_92 = arith.constant dense<0.000000e+00> : vector<8x384xf32>
    %276 = tpu.matmul %266, %275, %cst_92 {dimension_numbers = #tpu.dot_dimension_numbers<[1], [0], [0], [1], [0, 0, 1, 1], [], []>} : vector<8x128xf32>, vector<128x384xf32>, vector<8x384xf32> -> vector<8x384xf32>
    %277 = vector.extract_strided_slice %274 {offsets = [0, 0], sizes = [8, 128], strides = [1, 1]} : vector<8x384xf32> to vector<8x128xf32>
    %278 = vector.extract_strided_slice %276 {offsets = [0, 0], sizes = [8, 128], strides = [1, 1]} : vector<8x384xf32> to vector<8x128xf32>
    %279 = arith.addf %277, %278 : vector<8x128xf32>
    %280 = arith.negf %279 : vector<8x128xf32>
    %281 = math.exp %280 : vector<8x128xf32>
    %cst_93 = arith.constant 1.000000e+00 : f32
    %282 = vector.broadcast %cst_93 : f32 to vector<8x128xf32>
    %283 = arith.addf %282, %281 : vector<8x128xf32>
    %284 = arith.divf %282, %283 : vector<8x128xf32>
    %285 = vector.extract_strided_slice %274 {offsets = [0, 128], sizes = [8, 128], strides = [1, 1]} : vector<8x384xf32> to vector<8x128xf32>
    %286 = vector.extract_strided_slice %276 {offsets = [0, 128], sizes = [8, 128], strides = [1, 1]} : vector<8x384xf32> to vector<8x128xf32>
    %287 = arith.addf %285, %286 : vector<8x128xf32>
    %288 = arith.negf %287 : vector<8x128xf32>
    %289 = math.exp %288 : vector<8x128xf32>
    %cst_94 = arith.constant 1.000000e+00 : f32
    %290 = vector.broadcast %cst_94 : f32 to vector<8x128xf32>
    %291 = arith.addf %290, %289 : vector<8x128xf32>
    %292 = arith.divf %290, %291 : vector<8x128xf32>
    %293 = vector.extract_strided_slice %274 {offsets = [0, 256], sizes = [8, 128], strides = [1, 1]} : vector<8x384xf32> to vector<8x128xf32>
    %294 = vector.extract_strided_slice %276 {offsets = [0, 256], sizes = [8, 128], strides = [1, 1]} : vector<8x384xf32> to vector<8x128xf32>
    %c0_95 = arith.constant 0 : index
    %c0_96 = arith.constant 0 : index
    %295 = vector.load %arg6[%c0_95, %c0_96] : memref<1x128xf32, #tpu.memory_space<vmem>>, vector<1x128xf32>
    %296 = vector.broadcast %295 : vector<1x128xf32> to vector<8x128xf32>
    %297 = arith.addf %294, %296 : vector<8x128xf32>
    %298 = arith.mulf %284, %297 : vector<8x128xf32>
    %299 = arith.addf %293, %298 : vector<8x128xf32>
    %300 = math.tanh %299 : vector<8x128xf32>
    %301 = arith.subf %266, %300 : vector<8x128xf32>
    %302 = arith.mulf %292, %301 : vector<8x128xf32>
    %303 = arith.addf %300, %302 : vector<8x128xf32>
    %304 = arith.index_cast %c7_i32 : i32 to index
    %c0_97 = arith.constant 0 : index
    %c0_98 = arith.constant 0 : index
    %305 = vector.load %arg8[%304, %c0_97, %c0_98] : memref<8x8x128xf32, #tpu.memory_space<vmem>>, vector<1x8x128xf32>
    %306 = vector.shape_cast %305 : vector<1x8x128xf32> to vector<8x128xf32>
    %307 = vector.shape_cast %303 : vector<8x128xf32> to vector<1x8x128xf32>
    tpu.vector_store %arg8[%304, %c0_97, %c0_98], %307 {strides = array<i32>} : memref<8x8x128xf32, #tpu.memory_space<vmem>>, vector<1x8x128xf32>,
    %c8_i32_99 = arith.constant 8 : i32
    %c0_100 = arith.constant 0 : index
    %c0_101 = arith.constant 0 : index
    %308 = vector.load %arg9[%c0_100, %c0_101] : memref<8x128xf32, #tpu.memory_space<vmem>>, vector<8x128xf32>
    tpu.vector_store %arg9[%c0_100, %c0_101], %303 {strides = array<i32>} : memref<8x128xf32, #tpu.memory_space<vmem>>, vector<8x128xf32>,
    return
  }
  func.func @transform_0(%arg0: i32, %arg1: i32) -> (i32, i32, i32) {
    %c0_i32 = arith.constant 0 : i32
    %c0_i32_0 = arith.constant 0 : i32
    return %arg1, %arg0, %c0_i32 : i32, i32, i32
  }
  func.func @transform_1(%arg0: i32, %arg1: i32) -> (i32, i32) {
    %c0_i32 = arith.constant 0 : i32
    %c0_i32_0 = arith.constant 0 : i32
    %c0_i32_1 = arith.constant 0 : i32
    return %c0_i32, %c0_i32_0 : i32, i32
  }
  func.func @transform_2(%arg0: i32, %arg1: i32) -> (i32, i32) {
    %c0_i32 = arith.constant 0 : i32
    %c0_i32_0 = arith.constant 0 : i32
    %c0_i32_1 = arith.constant 0 : i32
    return %c0_i32, %c0_i32_0 : i32, i32
  }
  func.func @transform_3(%arg0: i32, %arg1: i32) -> (i32, i32) {
    %c0_i32 = arith.constant 0 : i32
    %c0_i32_0 = arith.constant 0 : i32
    %c0_i32_1 = arith.constant 0 : i32
    return %c0_i32, %c0_i32_0 : i32, i32
  }
  func.func @transform_4(%arg0: i32, %arg1: i32) -> (i32, i32) {
    %c0_i32 = arith.constant 0 : i32
    %c0_i32_0 = arith.constant 0 : i32
    %c0_i32_1 = arith.constant 0 : i32
    return %c0_i32, %c0_i32_0 : i32, i32
  }
  func.func @transform_5(%arg0: i32, %arg1: i32) -> (i32, i32) {
    %c0_i32 = arith.constant 0 : i32
    %c0_i32_0 = arith.constant 0 : i32
    return %arg0, %c0_i32 : i32, i32
  }
  func.func @transform_6(%arg0: i32, %arg1: i32) -> (i32, i32, i32) {
    %c0_i32 = arith.constant 0 : i32
    %c0_i32_0 = arith.constant 0 : i32
    return %arg1, %arg0, %c0_i32 : i32, i32, i32
  }
  func.func @transform_7(%arg0: i32, %arg1: i32) -> (i32, i32) {
    %c0_i32 = arith.constant 0 : i32
    %c0_i32_0 = arith.constant 0 : i32
    return %arg0, %c0_i32 : i32, i32
  }
}

</mosaic_0001>

<bundles_post_ra>
// kernel: tpu_custom_call.1
= control target key start
LH: loop header
LB: loop body
LE: loop exit
PB: predicated region body
PF: predicated region fallthrough
CT: control target
= control target key end

     0   :  { %13 = vsyncpa [#allocation4], 0  ;;  %s4097_s0 = inlined_call_operand.hbm [shape: f32[8,8,128], index: 0, kind: input, shape index: {}]   ;;  %s4098_s1 = inlined_call_operand.hbm [shape: f32[128,384], index: 1, kind: input, shape index: {}]   ;;  %s4099_s2 = inlined_call_operand.hbm [shape: f32[128,384], index: 2, kind: input, shape index: {}]   ;;  %s4100_s3 = inlined_call_operand.vmem [shape: f32[1,384], index: 3, kind: input, shape index: {}]   ;;  %s4101_s4 = inlined_call_operand.vmem [shape: f32[1,128], index: 4, kind: input, shape index: {}]   ;;  %s4102_s5 = inlined_call_operand.vmem [shape: f32[8,128], index: 5, kind: input, shape index: {}]   ;;  %s4103_s6 = inlined_call_operand.hbm [shape: f32[8,8,128], index: 6, kind: output, shape index: {0}]   ;;  %s4104_s7 = inlined_call_operand.hbm [shape: f32[8,128], index: 7, kind: output, shape index: {1}]  }
   0x1   :  { %14 = vsyncpa [#allocation7], 0 }
   0x2   :  { %15 = vsyncpa [#allocation5], 0 }
   0x3   :  { %16 = vsyncpa [#allocation11], 0  ;;  %s3491_s24 = smov [#allocation6]   ;;  %s3373_s28 = scalar_lea.hbm %s4098_s1, 6144 }
   0x4   :  { %s34_s25 = sshll.u32 %s3491_s24, 4  ;;  %p3374_p0 = scmp.ne.s32.totalorder %s4098_s1, %s3373_s28  ;;  %s35_s25 = int_to_ptr.vmem [resolvable:$true] %s34_s25 }
   0x5   :  { %p3377_p1 = scmp.lt.u32.totalorder %s3373_s28, %s4098_s1 }
   0x7   :  { %p3379_p2 = pnand %p3377_p1, %p3374_p0 }
   0x9   :  { %3382 = shalt.err (!%p3379_p2)
}
   0xa   :  { %s3383_s10 = scalar_lea.vmem %s35_s25, 6144  ;;  %p3388_p4 = scmp.lt.s32.totalorder %s35_s25, %s35_s25 }
   0xb   :  { %p3384_p3 = scmp.ne.s32.totalorder %s35_s25, %s3383_s10  ;;  %p3389_p5 = scmp.lt.s32.totalorder %s3383_s10, %s3383_s10 }
   0xd   :  { %p3390_p6 = por %p3389_p5, %p3388_p4 }
   0xf   :  { %p3391_p7 = pnand %p3390_p6, %p3384_p3 }
  0x11   :  { %3394 = shalt.err (!%p3391_p7)
}
  0x12   :  { %s3492_s11 = smov 384   ;;  %s3493_s12 = smov 24  }
  0x13   :  { %40 = dma.hbm_to_vmem [thread:$0]  %s4098_s1, 6144, %s35_s25, [#allocation7], %s3492_s11, %s3492_s11, %s3493_s12  }
  0x14   :  { %s3494_s15 = smov [#allocation3]   ;;  %s3395_s19 = scalar_lea.hbm %s4097_s0, 1024 }
  0x15   :  { %s22_s16 = sshll.u32 %s3494_s15, 4  ;;  %p3396_p8 = scmp.ne.s32.totalorder %s4097_s0, %s3395_s19  ;;  %s23_s16 = int_to_ptr.vmem [resolvable:$true] %s22_s16 }
  0x16   :  { %p3399_p9 = scmp.lt.u32.totalorder %s3395_s19, %s4097_s0 }
  0x18   :  { %p3401_p10 = pnand %p3399_p9, %p3396_p8 }
  0x1a   :  { %3404 = shalt.err (!%p3401_p10)
}
  0x1b   :  { %s3405_s24 = scalar_lea.vmem %s23_s16, 1024  ;;  %p3410_p12 = scmp.lt.s32.totalorder %s23_s16, %s23_s16 }
  0x1c   :  { %p3406_p11 = scmp.ne.s32.totalorder %s23_s16, %s3405_s24  ;;  %p3411_p13 = scmp.lt.s32.totalorder %s3405_s24, %s3405_s24 }
  0x1e   :  { %p3412_p0 = por %p3411_p13, %p3410_p12 }
  0x20   :  { %p3413_p1 = pnand %p3412_p0, %p3406_p11 }
  0x22   :  { %3416 = shalt.err (!%p3413_p1)
}
  0x23   :  { %s3495_s1 = smov 128   ;;  %s3496_s25 = smov 8  }
  0x24   :  { %28 = dma.hbm_to_vmem [thread:$0]  %s4097_s0, 1024, %s23_s16, [#allocation4], %s3495_s1, %s3495_s1, %s3496_s25  }
  0x25   :  { %s3497_s28 = smov [#allocation8]   ;;  %s3417_s9 = scalar_lea.hbm %s4099_s2, 6144 }
  0x26   :  { %s46_s29 = sshll.u32 %s3497_s28, 4  ;;  %p3418_p2 = scmp.ne.s32.totalorder %s4099_s2, %s3417_s9  ;;  %s47_s29 = int_to_ptr.vmem [resolvable:$true] %s46_s29 }
  0x27   :  { %p3421_p3 = scmp.lt.u32.totalorder %s3417_s9, %s4099_s2 }
  0x29   :  { %p3423_p4 = pnand %p3421_p3, %p3418_p2 }
  0x2b   :  { %3426 = shalt.err (!%p3423_p4)
}
  0x2c   :  { %s3427_s17 = scalar_lea.vmem %s47_s29, 6144  ;;  %p3432_p6 = scmp.lt.s32.totalorder %s47_s29, %s47_s29 }
  0x2d   :  { %p3428_p5 = scmp.ne.s32.totalorder %s47_s29, %s3427_s17  ;;  %p3433_p7 = scmp.lt.s32.totalorder %s3427_s17, %s3427_s17 }
  0x2f   :  { %p3434_p8 = por %p3433_p7, %p3432_p6 }
  0x31   :  { %p3435_p9 = pnand %p3434_p8, %p3428_p5 }
  0x33   :  { %3438 = shalt.err (!%p3435_p9)
}
  0x34   :  { %52 = dma.hbm_to_vmem [thread:$0]  %s4099_s2, 6144, %s47_s29, [#allocation7], %s3492_s11, %s3492_s11, %s3493_s12  }
  0x35   :  { %3483 = dma.done.wait [#allocation4], 1024  }
  0x36   :  { %3484 = vsyncadd [#allocation4], 4294966272 }
  0x37   :  { %3485 = dma.done.wait [#allocation7], 12288  }
  0x38   :  { %3486 = vsyncadd [#allocation7], 4294955008  ;;  %v3498_v0 = vmov 0.0   ;;  %v83_v1 = vld [vmem:[#allocation6 + $0x8] sm:$0xff]  ;;  %v86_v2 = vld [vmem:[#allocation6 + $0x20] sm:$0xff]  ;;  %vm3500_vm0 = vmmov 0  }
  0x39   :  { %211 = vmatprep.mubr.f32.mxu0 %v3498_v0  ;;  %v82_v3 = vld [vmem:[#allocation6] sm:$0xff]  ;;  %v2737_v4 = vpack.c.bf16 %v86_v2, %v83_v1  ;;  %v85_v5 = vld [vmem:[#allocation6 + $0x18] sm:$0xff]  ;;  %v92_v7 = vld [vmem:[#allocation6 + $0x50] sm:$0xff]  ;;  %s3502_s22 = smov [#allocation10]  }
  0x3a   :  { %v89_v6 = vld [vmem:[#allocation6 + $0x38] sm:$0xff]  ;;  %v2739_v8 = vpack.c.bf16 %v85_v5, %v82_v3  ;;  %v88_v10 = vld [vmem:[#allocation6 + $0x30] sm:$0xff]  ;;  %v91_v11 = vld [vmem:[#allocation6 + $0x48] sm:$0xff]  ;;  %s2208_s23 = sshll.u32 %s3502_s22, 4  ;;  %s2209_s23 = int_to_ptr.vmem [resolvable:$true] %s2208_s23 }
  0x3b   :  { %v2741_v9 = vpack.c.bf16 %v92_v7, %v89_v6  ;;  %v95_v12 = vld [vmem:[#allocation6 + $0x68] sm:$0xff]  ;;  %2738 = vmatprep.subr.bf16.mxu0 %v2737_v4  ;;  %v98_v13 = vld [vmem:[#allocation6 + $0x80] sm:$0xff]  ;;  %v2743_v14 = vpack.c.bf16 %v91_v11, %v88_v10  ;;  %v97_v17 = vld [vmem:[#allocation6 + $0x78] sm:$0xff] }
  0x3c   :  { %2740 = vmatpush1.bf16.msra.mxu0 %v2739_v8  ;;  %v2745_v15 = vpack.c.bf16 %v98_v13, %v95_v12  ;;  %v94_v16 = vld [vmem:[#allocation6 + $0x60] sm:$0xff]  ;;  %v101_v18 = vld [vmem:[#allocation6 + $0x98] sm:$0xff]  ;;  %v104_v19 = vld [vmem:[#allocation6 + $0xb0] sm:$0xff] }
  0x3d   :  { %2742 = vmatprep.subr.bf16.mxu0 %v2741_v9  ;;  %v2747_v20 = vpack.c.bf16 %v97_v17, %v94_v16  ;;  %v100_v21 = vld [vmem:[#allocation6 + $0x90] sm:$0xff]  ;;  %v2749_v22 = vpack.c.bf16 %v104_v19, %v101_v18  ;;  %v103_v23 = vld [vmem:[#allocation6 + $0xa8] sm:$0xff]  ;;  %v110_v27 = vld [vmem:[#allocation6 + $0xe0] sm:$0xff] }
  0x3e   :  { %v84_v24 = vld [vmem:[#allocation6 + $0x10] sm:$0xff]  ;;  %v87_v25 = vld [vmem:[#allocation6 + $0x28] sm:$0xff]  ;;  %v90_v29 = vld [vmem:[#allocation6 + $0x40] sm:$0xff]  ;;  %v2751_v31 = vpack.c.bf16 %v103_v23, %v100_v21 }
  0x3f   :  { %v107_v26 = vld [vmem:[#allocation6 + $0xc8] sm:$0xff]  ;;  %v2769_v28 = vpack.c.bf16 %v87_v25, %v84_v24  ;;  %v93_v30 = vld [vmem:[#allocation6 + $0x58] sm:$0xff]  ;;  %v106_v32 = vld [vmem:[#allocation6 + $0xc0] sm:$0xff] }
  0x40   :  { %2744 = vmatpush1.bf16.msra.mxu0 %v2743_v14  ;;  %v2773_v33 = vpack.c.bf16 %v93_v30, %v90_v29  ;;  %v2753_v34 = vpack.c.bf16 %v110_v27, %v107_v26  ;;  %v109_v35 = vld [vmem:[#allocation6 + $0xd8] sm:$0xff]  ;;  %v3589_v36 = vld [vmem:[#allocation3] sm:$0xff]  ;;  %v96_v37 = vld [vmem:[#allocation6 + $0x70] sm:$0xff] }
  0x41   :  { %2746 = vmatprep.subr.bf16.mxu0 %v2745_v15  ;;  %2770 = vmatprep.subr.bf16.mxu1 %v2769_v28  ;;  %v113_v38 = vld [vmem:[#allocation6 + $0xf8] sm:$0xff]  ;;  %v116_v39 = vld [vmem:[#allocation6 + $0x110] sm:$0xff]  ;;  %v99_v40 = vld [vmem:[#allocation6 + $0x88] sm:$0xff]  ;;  %v2755_v42 = vpack.c.bf16 %v109_v35, %v106_v32 }
  0x42   :  { %2772 = vmatpush3.bf16.msra.mxu1 %v2769_v28  ;;  %2445 = vmatprep.mubr.f32.mxu1 %v3589_v36  ;;  %v2777_v41 = vpack.c.bf16 %v99_v40, %v96_v37  ;;  %v102_v43 = vld [vmem:[#allocation6 + $0xa0] sm:$0xff]  ;;  %v105_v44 = vld [vmem:[#allocation6 + $0xb8] sm:$0xff]  ;;  %v2757_v45 = vpack.c.bf16 %v116_v39, %v113_v38  ;;  %v112_v46 = vld [vmem:[#allocation6 + $0xf0] sm:$0xff]  ;;  %v3499_v40 = vmov 0.0|0.0  }
  0x43   :  { %2774 = vmatprep.subr.bf16.mxu1 %v2773_v33  ;;  %v115_v47 = vld [vmem:[#allocation6 + $0x108] sm:$0xff]  ;;  %v122_v49 = vld [vmem:[#allocation6 + $0x140] sm:$0xff]  ;;  %v2781_v50 = vpack.c.bf16 %v105_v44, %v102_v43  ;;  %v108_v51 = vld [vmem:[#allocation6 + $0xd0] sm:$0xff] }
  0x44   :  { %2748 = vmatpush1.bf16.msra.mxu0 %v2747_v20  ;;  %v119_v48 = vld [vmem:[#allocation6 + $0x128] sm:$0xff]  ;;  %v2759_v53 = vpack.c.bf16 %v115_v47, %v112_v46  ;;  %v118_v55 = vld [vmem:[#allocation6 + $0x120] sm:$0xff]  ;;  %v121_v56 = vld [vmem:[#allocation6 + $0x138] sm:$0xff] }
  0x45   :  { %2750 = vmatprep.subr.bf16.mxu0 %v2749_v22  ;;  %v111_v52 = vld [vmem:[#allocation6 + $0xe8] sm:$0xff]  ;;  %v2761_v54 = vpack.c.bf16 %v122_v49, %v119_v48  ;;  %v125_v57 = vld [vmem:[#allocation6 + $0x158] sm:$0xff]  ;;  %v128_v58 = vld [vmem:[#allocation6 + $0x170] sm:$0xff]  ;;  %v2763_v62 = vpack.c.bf16 %v121_v56, %v118_v55 }
  0x46   :  { %2776 = vmatpush3.bf16.msra.mxu1 %v2773_v33  ;;  %v2785_v59 = vpack.c.bf16 %v111_v52, %v108_v51  ;;  %v114_v60 = vld [vmem:[#allocation6 + $0x100] sm:$0xff]  ;;  %v117_v61 = vld [vmem:[#allocation6 + $0x118] sm:$0xff]  ;;  %v2765_v63 = vpack.c.bf16 %v128_v58, %v125_v57  ;;  %v124_v1 = vld [vmem:[#allocation6 + $0x150] sm:$0xff] }
  0x47   :  { %2778 = vmatprep.subr.bf16.mxu1 %v2777_v41  ;;  %v127_v2 = vld [vmem:[#allocation6 + $0x168] sm:$0xff]  ;;  %v400_v4 = vld [vmem:[#allocation8 + $0x20] sm:$0xff]  ;;  %v2789_v5 = vpack.c.bf16 %v117_v61, %v114_v60  ;;  %v120_v6 = vld [vmem:[#allocation6 + $0x130] sm:$0xff] }
  0x48   :  { %2752 = vmatpush1.bf16.msra.mxu0 %v2751_v31  ;;  %v397_v3 = vld [vmem:[#allocation8 + $0x8] sm:$0xff]  ;;  %v2767_v8 = vpack.c.bf16 %v127_v2, %v124_v1  ;;  %v396_v10 = vld [vmem:[#allocation8] sm:$0xff]  ;;  %v399_v11 = vld [vmem:[#allocation8 + $0x18] sm:$0xff] }
  0x49   :  { %2754 = vmatprep.subr.bf16.mxu0 %v2753_v34  ;;  %v123_v7 = vld [vmem:[#allocation6 + $0x148] sm:$0xff]  ;;  %v3592_v9 = vpack.c.bf16 %v400_v4, %v397_v3  ;;  %v403_v12 = vld [vmem:[#allocation8 + $0x38] sm:$0xff]  ;;  %v406_v13 = vld [vmem:[#allocation8 + $0x50] sm:$0xff]  ;;  %v3594_v17 = vpack.c.bf16 %v399_v11, %v396_v10 }
  0x4a   :  { %2780 = vmatpush3.bf16.msra.mxu1 %v2777_v41  ;;  %v2793_v14 = vpack.c.bf16 %v123_v7, %v120_v6  ;;  %v126_v15 = vld [vmem:[#allocation6 + $0x160] sm:$0xff]  ;;  %v129_v16 = vld [vmem:[#allocation6 + $0x178] sm:$0xff]  ;;  %v3597_v18 = vpack.c.bf16 %v406_v13, %v403_v12  ;;  %v402_v19 = vld [vmem:[#allocation8 + $0x30] sm:$0xff] }
  0x4b   :  { %2782 = vmatprep.subr.bf16.mxu1 %v2781_v50  ;;  %v405_v20 = vld [vmem:[#allocation8 + $0x48] sm:$0xff]  ;;  %v412_v22 = vld [vmem:[#allocation8 + $0x80] sm:$0xff]  ;;  %v2797_v23 = vpack.c.bf16 %v129_v16, %v126_v15  ;;  %v411_v28 = vld [vmem:[#allocation8 + $0x78] sm:$0xff] }
  0x4c   :  { %2756 = vmatpush1.bf16.msra.mxu0 %v2755_v42  ;;  %v409_v21 = vld [vmem:[#allocation8 + $0x68] sm:$0xff]  ;;  %v3602_v25 = vpack.c.bf16 %v405_v20, %v402_v19  ;;  %v408_v27 = vld [vmem:[#allocation8 + $0x60] sm:$0xff]  ;;  %v415_v29 = vld [vmem:[#allocation8 + $0x98] sm:$0xff] }
  0x4d   :  { %2758 = vmatprep.subr.bf16.mxu0 %v2757_v45  ;;  %v75_v24 = vld [vmem:[#allocation3 + $0x8] sm:$0xff]  ;;  %v3605_v26 = vpack.c.bf16 %v412_v22, %v409_v21  ;;  %v418_v30 = vld [vmem:[#allocation8 + $0xb0] sm:$0xff]  ;;  %v3609_v34 = vpack.c.bf16 %v411_v28, %v408_v27  ;;  %v424_v39 = vld [vmem:[#allocation8 + $0xe0] sm:$0xff] }
  0x4e   :  { %2784 = vmatpush3.bf16.msra.mxu1 %v2781_v50  ;;  %v398_v31 = vld [vmem:[#allocation8 + $0x10] sm:$0xff]  ;;  %v401_v32 = vld [vmem:[#allocation8 + $0x28] sm:$0xff]  ;;  %v3612_v35 = vpack.c.bf16 %v418_v30, %v415_v29  ;;  %v404_v42 = vld [vmem:[#allocation8 + $0x40] sm:$0xff] }
  0x4f   :  { %2786 = vmatprep.subr.bf16.mxu1 %v2785_v59  ;;  %v76_v33 = vld [vmem:[#allocation3 + $0x10] sm:$0xff]  ;;  %v417_v37 = vld [vmem:[#allocation8 + $0xa8] sm:$0xff]  ;;  %v3615_v41 = vpack.c.bf16 %v401_v32, %v398_v31  ;;  %v407_v43 = vld [vmem:[#allocation8 + $0x58] sm:$0xff] }
  0x50   :  { %2760 = vmatpush1.bf16.msra.mxu0 %v2759_v53  ;;  %v421_v38 = vld [vmem:[#allocation8 + $0xc8] sm:$0xff]  ;;  %v77_v44 = vld [vmem:[#allocation3 + $0x18] sm:$0xff]  ;;  %v420_v47 = vld [vmem:[#allocation8 + $0xc0] sm:$0xff]  ;;  %v3625_v51 = vpack.c.bf16 %v407_v43, %v404_v42 }
  0x51   :  { %2762 = vmatprep.subr.bf16.mxu0 %v2761_v54  ;;  %v3622_v46 = vpack.c.bf16 %v424_v39, %v421_v38  ;;  %v423_v48 = vld [vmem:[#allocation8 + $0xd8] sm:$0xff]  ;;  %v430_v50 = vld [vmem:[#allocation8 + $0x110] sm:$0xff]  ;;  %v413_v53 = vld [vmem:[#allocation8 + $0x88] sm:$0xff] }
  0x52   :  { %2788 = vmatpush3.bf16.msra.mxu1 %v2785_v59  ;;  %v427_v49 = vld [vmem:[#allocation8 + $0xf8] sm:$0xff]  ;;  %v410_v52 = vld [vmem:[#allocation8 + $0x70] sm:$0xff]  ;;  %v78_v54 = vld [vmem:[#allocation3 + $0x20] sm:$0xff]  ;;  %v3630_v55 = vpack.c.bf16 %v423_v48, %v420_v47 }
  0x53   :  { %2790 = vmatprep.subr.bf16.mxu1 %v2789_v5  ;;  %v3633_v56 = vpack.c.bf16 %v430_v50, %v427_v49  ;;  %v426_v57 = vld [vmem:[#allocation8 + $0xf0] sm:$0xff]  ;;  %v429_v58 = vld [vmem:[#allocation8 + $0x108] sm:$0xff]  ;;  %v436_v60 = vld [vmem:[#allocation8 + $0x140] sm:$0xff]  ;;  %v3636_v61 = vpack.c.bf16 %v413_v53, %v410_v52 }
  0x54   :  { %2764 = vmatpush1.bf16.msra.mxu0 %v2763_v62  ;;  %v433_v59 = vld [vmem:[#allocation8 + $0x128] sm:$0xff]  ;;  %v416_v62 = vld [vmem:[#allocation8 + $0xa0] sm:$0xff]  ;;  %v3641_v2 = vpack.c.bf16 %v429_v58, %v426_v57  ;;  %v80_v3 = vld [vmem:[#allocation3 + $0x30] sm:$0xff] }
  0x55   :  { %2766 = vmatprep.subr.bf16.mxu0 %v2765_v63  ;;  %v419_v63 = vld [vmem:[#allocation8 + $0xb8] sm:$0xff]  ;;  %v79_v1 = vld [vmem:[#allocation3 + $0x28] sm:$0xff]  ;;  %v3644_v4 = vpack.c.bf16 %v436_v60, %v433_v59  ;;  %v422_v11 = vld [vmem:[#allocation8 + $0xd0] sm:$0xff] }
  0x56   :  { %2792 = vmatpush3.bf16.msra.mxu1 %v2789_v5  ;;  %v432_v5 = vld [vmem:[#allocation8 + $0x120] sm:$0xff]  ;;  %v435_v6 = vld [vmem:[#allocation8 + $0x138] sm:$0xff]  ;;  %v3647_v10 = vpack.c.bf16 %v419_v63, %v416_v62  ;;  %v425_v12 = vld [vmem:[#allocation8 + $0xe8] sm:$0xff] }
  0x57   :  { %2794 = vmatprep.subr.bf16.mxu1 %v2793_v14  ;;  %v439_v7 = vld [vmem:[#allocation8 + $0x158] sm:$0xff]  ;;  %v3652_v13 = vpack.c.bf16 %v435_v6, %v432_v5  ;;  %v438_v16 = vld [vmem:[#allocation8 + $0x150] sm:$0xff]  ;;  %v441_v19 = vld [vmem:[#allocation8 + $0x168] sm:$0xff]  ;;  %v3658_v20 = vpack.c.bf16 %v425_v12, %v422_v11 }
  0x58   :  { %2768 = vmatpush1.bf16.msra.mxu0 %v2767_v8  ;;  %v442_v8 = vld [vmem:[#allocation8 + $0x170] sm:$0xff]  ;;  %v428_v21 = vld [vmem:[#allocation8 + $0x100] sm:$0xff]  ;;  %v431_v22 = vld [vmem:[#allocation8 + $0x118] sm:$0xff] }
  0x59   :  { %2802 = vmatprep.subr.bf16.mxu0 %v3592_v9  ;;  %v3655_v15 = vpack.c.bf16 %v442_v8, %v439_v7  ;;  %v434_v27 = vld [vmem:[#allocation8 + $0x130] sm:$0xff]  ;;  %v437_v28 = vld [vmem:[#allocation8 + $0x148] sm:$0xff]  ;;  %v3677_v29 = vld [vmem:[%s4102_s5] sm:$0xff] }
  0x5a   :  { %2796 = vmatpush3.bf16.msra.mxu1 %v2793_v14  ;;  %v81_v14 = vld [vmem:[#allocation3 + $0x38] sm:$0xff]  ;;  %v3681_v30 = vpack.c.bf16 %v437_v28, %v434_v27  ;;  %v440_v31 = vld [vmem:[#allocation8 + $0x160] sm:$0xff] }
  0x5b   :  { %212 = vmatmul.mubr.f32.vlgmr.msra.gmra.mrb[0].mxu0 %v3589_v36  ;;  %2798 = vmatprep.subr.bf16.mxu1 %v2797_v23  ;;  %v414_v36 = vld [vmem:[#allocation8 + $0x90] sm:$0xff]  ;;  %v443_v32 = vld [vmem:[#allocation8 + $0x178] sm:$0xff]  ;;  %v130_v39 = vld [vmem:[%s4100_s3] sm:$0x7] }
  0x5c   :  { %2804 = vmatpush1.bf16.msra.mxu0 %v3594_v17  ;;  %217 = vmatprep.mubr.f32.mxu0 %v3498_v0  ;;  %v3619_v45 = vpack.c.bf16 %v417_v37, %v414_v36  ;;  %v132_v36 = vlaneseq  ;;  %v3753_v28 = vld [vmem:[%s4101_s4] ss:$0 sm:$0xff] }
  0x5d   :  { %2806 = vmatprep.subr.bf16.mxu0 %v3597_v18 }
  0x5e   :  { %2800 = vmatpush3.bf16.msra.mxu1 %v2797_v23  ;;  %v3665_v23 = vpack.c.bf16 %v441_v19, %v438_v16  ;;  %v133_v37 = vshrl.u32 %v132_v36, 7 }
  0x5f   :  { %218 = vmatmul.mubr.f32.gmra.mrb[2].mxu0 %v75_v24  ;;  %2833 = vmatprep.subr.bf16.mxu1 %v3499_v40 }
  0x60   :  { %2808 = vmatpush1.bf16.msra.mxu0 %v3602_v25  ;;  %223 = vmatprep.mubr.f32.mxu0 %v3498_v0  ;;  %v142_v38 = vsub.s32 2, %v133_v37  ;;  %v138_v7 = vsub.s32 1, %v133_v37 }
  0x61   :  { %2810 = vmatprep.subr.bf16.mxu0 %v3605_v26  ;;  %2446 = vmatmul.mubr.f32.vlgmr.msra.gmra.mrb[0].mxu1 %v75_v24  ;;  %v3669_v24 = vpack.c.bf16 %v431_v22, %v428_v21 }
  0x62   :  { %2835 = vmatpush3.bf16.msra.mxu1 %v3615_v41  ;;  %2448 = vmatprep.mubr.f32.mxu1 %v76_v33  ;;  %v143_v42 = vrot.slane %v130_v39, %v142_v38  ;;  %v3747_v12 = vrot.slane %v130_v39, %v138_v7 }
  0x63   :  { %224 = vmatmul.mubr.f32.gmra.mrb[4].mxu0 %v76_v33  ;;  %2836 = vmatprep.subr.bf16.mxu1 %v3499_v40  ;;  %v3689_v33 = vpack.c.bf16 %v443_v32, %v440_v31 }
  0x64   :  { %2812 = vmatpush1.bf16.msra.mxu0 %v3609_v34  ;;  %229 = vmatprep.mubr.f32.mxu0 %v3498_v0 }
  0x65   :  { %2814 = vmatprep.subr.bf16.mxu0 %v3612_v35  ;;  %2449 = vmatmul.mubr.f32.gmra.mrb[2].mxu1 %v77_v44 }
  0x66   :  { %2838 = vmatpush3.bf16.msra.mxu1 %v3625_v51  ;;  %2451 = vmatprep.mubr.f32.mxu1 %v78_v54 }
  0x67   :  { %230 = vmatmul.mubr.f32.gmra.mrb[6].mxu0 %v77_v44  ;;  %2839 = vmatprep.subr.bf16.mxu1 %v3499_v40 }
  0x68   :  { %2816 = vmatpush1.bf16.msra.mxu0 %v3619_v45  ;;  %235 = vmatprep.mubr.f32.mxu0 %v3498_v0 }
  0x69   :  { %2818 = vmatprep.subr.bf16.mxu0 %v3622_v46  ;;  %2452 = vmatmul.mubr.f32.gmra.mrb[4].mxu1 %v79_v1 }
  0x6a   :  { %2841 = vmatpush3.bf16.msra.mxu1 %v3636_v61  ;;  %2454 = vmatprep.mubr.f32.mxu1 %v80_v3 }
  0x6b   :  { %236 = vmatmul.mubr.f32.gmra.mrb[8].mxu0 %v78_v54  ;;  %2842 = vmatprep.subr.bf16.mxu1 %v3499_v40 }
  0x6c   :  { %2820 = vmatpush1.bf16.msra.mxu0 %v3630_v55  ;;  %241 = vmatprep.mubr.f32.mxu0 %v3498_v0 }
  0x6d   :  { %2822 = vmatprep.subr.bf16.mxu0 %v3633_v56  ;;  %2455 = vmatmul.mubr.f32.gmra.mrb[6].mxu1 %v81_v14 }
  0x6e   :  { %2844 = vmatpush3.bf16.msra.mxu1 %v3647_v10  ;;  %2489 = vmatprep.mubr.msk.f32.mxu1 %vm3500_vm0, %v3498_v0 }
  0x6f   :  { %242 = vmatmul.mubr.f32.gmra.mrb[10].mxu0 %v79_v1  ;;  %2845 = vmatprep.subr.bf16.mxu1 %v3499_v40  ;;  %v134_v1 = vsub.s32 0, %v133_v37 }
  0x70   :  { %2824 = vmatpush1.bf16.msra.mxu0 %v3641_v2  ;;  %247 = vmatprep.mubr.f32.mxu0 %v3498_v0 }
  0x71   :  { %2826 = vmatprep.subr.bf16.mxu0 %v3644_v4 }
  0x72   :  { %2847 = vmatpush3.bf16.msra.mxu1 %v3658_v20 }
  0x73   :  { %248 = vmatmul.mubr.f32.gmra.mrb[12].mxu0 %v80_v3  ;;  %2848 = vmatprep.subr.bf16.mxu1 %v3499_v40  ;;  %v3744_v3 = vrot.slane %v130_v39, %v134_v1 }
  0x74   :  { %2828 = vmatpush1.bf16.msra.mxu0 %v3652_v13  ;;  %253 = vmatprep.mubr.f32.mxu0 %v3498_v0 }
  0x75   :  { %2830 = vmatprep.subr.bf16.mxu0 %v3655_v15 }
  0x76   :  { %2850 = vmatpush3.bf16.msra.mxu1 %v3669_v24 }
  0x77   :  { %254 = vmatmul.mubr.f32.gmra.mrb[14].mxu0 %v81_v14  ;;  %2851 = vmatprep.subr.bf16.mxu1 %v3499_v40 }
  0x78   :  { %2832 = vmatpush1.bf16.msra.mxu0 %v3665_v23  ;;  %508 = vmatprep.mubr.f32.mxu0 %v3498_v0 }
  0x79   :  { %2858 = vmatprep.subr.bf16.mxu0 %v3592_v9 }
  0x7a   :  { %2853 = vmatpush3.bf16.msra.mxu1 %v3681_v30 }
  0x7b   :  { %509 = vmatmul.mubr.f32.vlgmr.msra.gmra.mrb[0].mxu0 %v3677_v29  ;;  %2854 = vmatprep.subr.bf16.mxu1 %v3499_v40 }
  0x7c   :  { %2860 = vmatpush1.bf16.msra.mxu0 %v3594_v17  ;;  %732 = vmatprep.mubr.f32.mxu0 %v3498_v0 }
  0x7d   :  { %2862 = vmatprep.subr.bf16.mxu0 %v3597_v18 }
  0x7e   :  { %2856 = vmatpush3.bf16.msra.mxu1 %v3689_v33 }
  0x7f   :  { %2889 = vmatprep.subr.bf16.mxu1 %v3499_v40 }
  0x80   :  { %2864 = vmatpush1.bf16.msra.mxu0 %v3602_v25 }
  0x81   :  { %2866 = vmatprep.subr.bf16.mxu0 %v3605_v26  ;;  %2490 = vmatmul.mubr.f32.vlgmr.msra.gmra.mrb[8].mxu1 %v3677_v29 }
  0x82   :  { %2891 = vmatpush3.bf16.msra.mxu1 %v3615_v41  ;;  %2524 = vmatprep.mubr.msk.f32.mxu1 %vm3500_vm0, %v3498_v0 }
  0x83   :  { %2892 = vmatprep.subr.bf16.mxu1 %v3499_v40 }
  0x84   :  { %2868 = vmatpush1.bf16.msra.mxu0 %v3609_v34 }
  0x85   :  { %2870 = vmatprep.subr.bf16.mxu0 %v3612_v35 }
  0x86   :  { %2894 = vmatpush3.bf16.msra.mxu1 %v3625_v51 }
  0x87   :  { %2895 = vmatprep.subr.bf16.mxu1 %v3499_v40 }
  0x88   :  { %2872 = vmatpush1.bf16.msra.mxu0 %v3619_v45 }
  0x89   :  { %2874 = vmatprep.subr.bf16.mxu0 %v3622_v46 }
  0x8a   :  { %2897 = vmatpush3.bf16.msra.mxu1 %v3636_v61 }
  0x8b   :  { %2898 = vmatprep.subr.bf16.mxu1 %v3499_v40 }
  0x8c   :  { %2876 = vmatpush1.bf16.msra.mxu0 %v3630_v55 }
  0x8d   :  { %2878 = vmatprep.subr.bf16.mxu0 %v3633_v56 }
  0x8e   :  { %2900 = vmatpush3.bf16.msra.mxu1 %v3647_v10 }
  0x8f   :  { %2901 = vmatprep.subr.bf16.mxu1 %v3499_v40 }
  0x90   :  { %2880 = vmatpush1.bf16.msra.mxu0 %v3641_v2 }
  0x91   :  { %2882 = vmatprep.subr.bf16.mxu0 %v3644_v4 }
  0x92   :  { %2903 = vmatpush3.bf16.msra.mxu1 %v3658_v20 }
  0x93   :  { %2904 = vmatprep.subr.bf16.mxu1 %v3499_v40 }
  0x94   :  { %2884 = vmatpush1.bf16.msra.mxu0 %v3652_v13 }
  0x95   :  { %2886 = vmatprep.subr.bf16.mxu0 %v3655_v15 }
  0x96   :  { %2906 = vmatpush3.bf16.msra.mxu1 %v3669_v24 }
  0x97   :  { %2907 = vmatprep.subr.bf16.mxu1 %v3499_v40 }
  0x98   :  { %2888 = vmatpush1.bf16.msra.mxu0 %v3665_v23 }
  0x99   :  { %2914 = vmatprep.subr.bf16.mxu0 %v3592_v9 }
  0x9a   :  { %2909 = vmatpush3.bf16.msra.mxu1 %v3681_v30 }
  0x9b   :  { %2910 = vmatprep.subr.bf16.mxu1 %v3499_v40 }
  0x9e   :  { %2912 = vmatpush3.bf16.msra.mxu1 %v3689_v33 }
  0x9f   :  { %2945 = vmatprep.subr.bf16.mxu1 %v3499_v40 }
 0x134   :  { %v2447_v43 = vpop.f32.mrb[0].mxu1 }
 0x135   :  { %v3730_v44 = vadd.f32 %v2447_v43, %v143_v42  ;;  %v326_v47 = vpop.f32.mrb[1].mxu1 }
 0x136   :  { %v327_v37 = vadd.f32 %v326_v47, %v143_v42 }
 0x138   :  { %v2450_v48 = vpop.f32.mrb[2].mxu1 }
 0x139   :  { %v3732_v49 = vadd.f32 %v2450_v48, %v143_v42  ;;  %v336_v50 = vpop.f32.mrb[3].mxu1 }
 0x13a   :  { %v3734_v52 = vadd.f32 %v336_v50, %v143_v42 }
 0x13c   :  { %v2453_v53 = vpop.f32.mrb[4].mxu1 }
 0x13d   :  { %v3736_v54 = vadd.f32 %v2453_v53, %v143_v42  ;;  %v346_v57 = vpop.f32.mrb[5].mxu1 }
 0x13e   :  { %v3738_v58 = vadd.f32 %v346_v57, %v143_v42 }
 0x140   :  { %v2456_v59 = vpop.f32.mrb[6].mxu1 }
 0x141   :  { %v3740_v60 = vadd.f32 %v2456_v59, %v143_v42  ;;  %v356_v62 = vpop.f32.mrb[7].mxu1 }
 0x142   :  { %v3742_v63 = vadd.f32 %v356_v62, %v143_v42 }
 0x14e   :  { %v510_v5 = vpop.f32.mrb[0].mxu0 }
 0x14f   :  { %v3249_v6 = vadd.f32 %v510_v5, %v3744_v3  ;;  %v512_v8 = vpop.f32.mrb[1].mxu0 }
 0x150   :  { %v3250_v14 = vadd.f32 %v512_v8, %v3747_v12 }
 0x151   :  { %v2229_v11 = vmul.f32 -1.442695, %v3249_v6 }
 0x152   :  { %v2230_v21 = vmul.f32 -1.442695, %v3250_v14 }
 0x153   :  { %3293 = vpow2.f32 %v2229_v11 }
 0x154   :  { %v581_v16 = vpop.f32.mrb[8].mxu1  ;;  %3295 = vpow2.f32 %v2230_v21 }
 0x155   :  { %v2491_v19 = vpop.f32.mrb[9].mxu1  ;;  %v606_v31 = vadd.f32 %v3753_v28, %v581_v16 }
 0x15d   :  { %v3294_v22 = vpop.eup %3293 }
 0x15e   :  { %v589_v27 = vadd.f32 1.0, %v3294_v22  ;;  %v3296_v32 = vpop.eup %3295 }
 0x15f   :  { %v596_v39 = vadd.f32 1.0, %v3296_v32 }
 0x160   :  { %3297 = vrcp.f32 %v589_v27 }
 0x16a   :  { %v3298_v36 = vpop.eup %3297 }
 0x16b   :  { %v607_v38 = vmul.f32 %v3298_v36, %v606_v31 }
 0x16d   :  { %v608_v43 = vadd.f32 %v607_v38, %v327_v37  ;;  %v1299_v38 = vld [vmem:[#allocation8 + $0x20] sm:$0xff] }
 0x16f   :  { %3299 = vtanh.f32 %v608_v43  ;;  %v1298_v43 = vld [vmem:[#allocation8 + $0x18] sm:$0xff] }
 0x170   :  { %3301 = vrcp.f32 %v596_v39 }
 0x179   :  { %v3300_v48 = vpop.eup %3299 }
 0x17a   :  { %v610_v50 = vsub.f32 %v3677_v29, %v3300_v48  ;;  %v3302_v53 = vpop.eup %3301 }
 0x17c   :  { %v611_v57 = vmul.f32 %v3302_v53, %v610_v50  ;;  %v1302_v50 = vld [vmem:[#allocation8 + $0x38] sm:$0xff] }
 0x17e   :  { %v3757_v59 = vadd.f32 %v3300_v48, %v611_v57  ;;  %v1301_v57 = vld [vmem:[#allocation8 + $0x30] sm:$0xff] }
 0x180   :  { %613 = vst [vmem:[#allocation9] sm:$0xff] %v3757_v59  ;;  %733 = vmatmul.mubr.f32.vlgmr.msra.gmra.mrb[2].mxu0 %v3757_v59  ;;  %2525 = vmatmul.mubr.f32.vlgmr.msra.gmra.mrb[10].mxu1 %v3757_v59 }
 0x181   :  { %2916 = vmatpush1.bf16.msra.mxu0 %v3594_v17  ;;  %2947 = vmatpush3.bf16.msra.mxu1 %v3615_v41 }
 0x182   :  { %2918 = vmatprep.subr.bf16.mxu0 %v3597_v18  ;;  %2948 = vmatprep.subr.bf16.mxu1 %v3499_v40 }
 0x183   :  { %957 = vmatprep.mubr.f32.mxu0 %v3498_v0  ;;  %2559 = vmatprep.mubr.msk.f32.mxu1 %vm3500_vm0, %v3498_v0 }
 0x185   :  { %2920 = vmatpush1.bf16.msra.mxu0 %v3602_v25  ;;  %2950 = vmatpush3.bf16.msra.mxu1 %v3625_v51 }
 0x186   :  { %2922 = vmatprep.subr.bf16.mxu0 %v3605_v26  ;;  %2951 = vmatprep.subr.bf16.mxu1 %v3499_v40 }
 0x189   :  { %2924 = vmatpush1.bf16.msra.mxu0 %v3609_v34  ;;  %2953 = vmatpush3.bf16.msra.mxu1 %v3636_v61 }
 0x18a   :  { %2926 = vmatprep.subr.bf16.mxu0 %v3612_v35  ;;  %2954 = vmatprep.subr.bf16.mxu1 %v3499_v40 }
 0x18d   :  { %2928 = vmatpush1.bf16.msra.mxu0 %v3619_v45  ;;  %2956 = vmatpush3.bf16.msra.mxu1 %v3647_v10 }
 0x18e   :  { %2930 = vmatprep.subr.bf16.mxu0 %v3622_v46  ;;  %2957 = vmatprep.subr.bf16.mxu1 %v3499_v40 }
 0x191   :  { %2932 = vmatpush1.bf16.msra.mxu0 %v3630_v55  ;;  %2959 = vmatpush3.bf16.msra.mxu1 %v3658_v20 }
 0x192   :  { %2934 = vmatprep.subr.bf16.mxu0 %v3633_v56  ;;  %2960 = vmatprep.subr.bf16.mxu1 %v3499_v40 }
 0x195   :  { %2936 = vmatpush1.bf16.msra.mxu0 %v3641_v2  ;;  %2962 = vmatpush3.bf16.msra.mxu1 %v3669_v24 }
 0x196   :  { %2938 = vmatprep.subr.bf16.mxu0 %v3644_v4  ;;  %2963 = vmatprep.subr.bf16.mxu1 %v3499_v40 }
 0x199   :  { %2940 = vmatpush1.bf16.msra.mxu0 %v3652_v13  ;;  %2965 = vmatpush3.bf16.msra.mxu1 %v3681_v30 }
 0x19a   :  { %2942 = vmatprep.subr.bf16.mxu0 %v3655_v15  ;;  %2966 = vmatprep.subr.bf16.mxu1 %v3499_v40 }
 0x19d   :  { %2944 = vmatpush1.bf16.msra.mxu0 %v3665_v23  ;;  %2968 = vmatpush3.bf16.msra.mxu1 %v3689_v33 }
 0x19e   :  { %2970 = vmatprep.subr.bf16.mxu0 %v3592_v9  ;;  %3001 = vmatprep.subr.bf16.mxu1 %v3499_v40 }
 0x253   :  { %v734_v29 = vpop.f32.mrb[2].mxu0  ;;  %v805_v42 = vpop.f32.mrb[10].mxu1 }
 0x254   :  { %v3251_v47 = vadd.f32 %v734_v29, %v3744_v3  ;;  %v736_v62 = vpop.f32.mrb[3].mxu0  ;;  %v2526_v1 = vpop.f32.mrb[11].mxu1  ;;  %v830_v9 = vadd.f32 %v3753_v28, %v805_v42  ;;  %v1308_v29 = vld [vmem:[#allocation8 + $0x68] sm:$0xff]  ;;  %v1311_v42 = vld [vmem:[#allocation8 + $0x80] sm:$0xff] }
 0x255   :  { %v3252_v6 = vadd.f32 %v736_v62, %v3747_v12  ;;  %v1307_v62 = vld [vmem:[#allocation8 + $0x60] sm:$0xff]  ;;  %v1310_v1 = vld [vmem:[#allocation8 + $0x78] sm:$0xff] }
 0x256   :  { %v2232_v5 = vmul.f32 -1.442695, %v3251_v47  ;;  %v3866_v47 = vpack.c.bf16 %v1311_v42, %v1308_v29 }
 0x257   :  { %v2233_v7 = vmul.f32 -1.442695, %v3252_v6  ;;  %v1314_v6 = vld [vmem:[#allocation8 + $0x98] sm:$0xff] }
 0x258   :  { %3303 = vpow2.f32 %v2232_v5  ;;  %v3868_v5 = vpack.c.bf16 %v1310_v1, %v1307_v62 }
 0x259   :  { %3305 = vpow2.f32 %v2233_v7  ;;  %v1317_v7 = vld [vmem:[#allocation8 + $0xb0] sm:$0xff] }
 0x262   :  { %v3304_v8 = vpop.eup %3303 }
 0x263   :  { %v813_v11 = vadd.f32 1.0, %v3304_v8  ;;  %v3306_v14 = vpop.eup %3305  ;;  %v3872_v8 = vpack.c.bf16 %v1317_v7, %v1314_v6 }
 0x264   :  { %v820_v22 = vadd.f32 1.0, %v3306_v14  ;;  %v1316_v14 = vld [vmem:[#allocation8 + $0xa8] sm:$0xff] }
 0x265   :  { %3307 = vrcp.f32 %v813_v11  ;;  %v1313_v11 = vld [vmem:[#allocation8 + $0x90] sm:$0xff] }
 0x26f   :  { %v3308_v16 = vpop.eup %3307 }
 0x270   :  { %v831_v19 = vmul.f32 %v3308_v16, %v830_v9  ;;  %v1315_v9 = vld [vmem:[#allocation8 + $0xa0] sm:$0xff]  ;;  %v3874_v16 = vpack.c.bf16 %v1316_v14, %v1313_v11 }
 0x272   :  { %v832_v21 = vadd.f32 %v831_v19, %v3730_v44  ;;  %v1318_v19 = vld [vmem:[#allocation8 + $0xb8] sm:$0xff] }
 0x274   :  { %3309 = vtanh.f32 %v832_v21  ;;  %v3877_v21 = vpack.c.bf16 %v1318_v19, %v1315_v9 }
 0x275   :  { %3311 = vrcp.f32 %v820_v22  ;;  %v1320_v22 = vld [vmem:[#allocation8 + $0xc8] sm:$0xff] }
 0x27e   :  { %v3310_v27 = vpop.eup %3309 }
 0x27f   :  { %v834_v31 = vsub.f32 %v3757_v59, %v3310_v27  ;;  %v3312_v32 = vpop.eup %3311 }
 0x281   :  { %v835_v36 = vmul.f32 %v3312_v32, %v834_v31  ;;  %v1319_v32 = vld [vmem:[#allocation8 + $0xc0] sm:$0xff] }
 0x283   :  { %v836_v37 = vadd.f32 %v3310_v27, %v835_v36  ;;  %v1323_v27 = vld [vmem:[#allocation8 + $0xe0] sm:$0xff]  ;;  %v1322_v36 = vld [vmem:[#allocation8 + $0xd8] sm:$0xff] }
 0x284   :  { %v3881_v31 = vpack.c.bf16 %v1323_v27, %v1320_v22 }
 0x285   :  { %838 = vst [vmem:[#allocation9 + $0x8] sm:$0xff] %v836_v37  ;;  %958 = vmatmul.mubr.f32.vlgmr.msra.gmra.mrb[4].mxu0 %v836_v37  ;;  %2560 = vmatmul.mubr.f32.vlgmr.msra.gmra.mrb[12].mxu1 %v836_v37 }
 0x286   :  { %2972 = vmatpush1.bf16.msra.mxu0 %v3594_v17  ;;  %3003 = vmatpush3.bf16.msra.mxu1 %v3615_v41 }
 0x287   :  { %2974 = vmatprep.subr.bf16.mxu0 %v3597_v18  ;;  %3004 = vmatprep.subr.bf16.mxu1 %v3499_v40 }
 0x288   :  { %1182 = vmatprep.mubr.f32.mxu0 %v3498_v0  ;;  %2594 = vmatprep.mubr.msk.f32.mxu1 %vm3500_vm0, %v3498_v0 }
 0x28a   :  { %2976 = vmatpush1.bf16.msra.mxu0 %v3602_v25  ;;  %3006 = vmatpush3.bf16.msra.mxu1 %v3625_v51 }
 0x28b   :  { %2978 = vmatprep.subr.bf16.mxu0 %v3605_v26  ;;  %3007 = vmatprep.subr.bf16.mxu1 %v3499_v40 }
 0x28e   :  { %2980 = vmatpush1.bf16.msra.mxu0 %v3609_v34  ;;  %3009 = vmatpush3.bf16.msra.mxu1 %v3636_v61 }
 0x28f   :  { %2982 = vmatprep.subr.bf16.mxu0 %v3612_v35  ;;  %3010 = vmatprep.subr.bf16.mxu1 %v3499_v40 }
 0x292   :  { %2984 = vmatpush1.bf16.msra.mxu0 %v3619_v45  ;;  %3012 = vmatpush3.bf16.msra.mxu1 %v3647_v10 }
 0x293   :  { %2986 = vmatprep.subr.bf16.mxu0 %v3622_v46  ;;  %3013 = vmatprep.subr.bf16.mxu1 %v3499_v40 }
 0x296   :  { %2988 = vmatpush1.bf16.msra.mxu0 %v3630_v55  ;;  %3015 = vmatpush3.bf16.msra.mxu1 %v3658_v20 }
 0x297   :  { %2990 = vmatprep.subr.bf16.mxu0 %v3633_v56  ;;  %3016 = vmatprep.subr.bf16.mxu1 %v3499_v40 }
 0x29a   :  { %2992 = vmatpush1.bf16.msra.mxu0 %v3641_v2  ;;  %3018 = vmatpush3.bf16.msra.mxu1 %v3669_v24 }
 0x29b   :  { %2994 = vmatprep.subr.bf16.mxu0 %v3644_v4  ;;  %3019 = vmatprep.subr.bf16.mxu1 %v3499_v40 }
 0x29e   :  { %2996 = vmatpush1.bf16.msra.mxu0 %v3652_v13  ;;  %3021 = vmatpush3.bf16.msra.mxu1 %v3681_v30 }
 0x29f   :  { %2998 = vmatprep.subr.bf16.mxu0 %v3655_v15  ;;  %3022 = vmatprep.subr.bf16.mxu1 %v3499_v40 }
 0x2a2   :  { %3000 = vmatpush1.bf16.msra.mxu0 %v3665_v23  ;;  %3024 = vmatpush3.bf16.msra.mxu1 %v3689_v33 }
 0x2a3   :  { %3057 = vmatprep.subr.bf16.mxu1 %v3499_v40 }
 0x358   :  { %v959_v17 = vpop.f32.mrb[4].mxu0  ;;  %v1030_v18 = vpop.f32.mrb[12].mxu1 }
 0x359   :  { %v3253_v25 = vadd.f32 %v959_v17, %v3744_v3  ;;  %v961_v26 = vpop.f32.mrb[5].mxu0  ;;  %v2561_v34 = vpop.f32.mrb[13].mxu1  ;;  %v1055_v4 = vadd.f32 %v3753_v28, %v1030_v18  ;;  %v3884_v17 = vpack.c.bf16 %v1322_v36, %v1319_v32  ;;  %v1324_v18 = vld [vmem:[#allocation8 + $0xe8] sm:$0xff] }
 0x35a   :  { %v3254_v45 = vadd.f32 %v961_v26, %v3747_v12  ;;  %v1329_v26 = vld [vmem:[#allocation8 + $0x110] sm:$0xff] }
 0x35b   :  { %v2235_v35 = vmul.f32 -1.442695, %v3253_v25  ;;  %v1326_v25 = vld [vmem:[#allocation8 + $0xf8] sm:$0xff] }
 0x35c   :  { %v2236_v46 = vmul.f32 -1.442695, %v3254_v45  ;;  %v1325_v45 = vld [vmem:[#allocation8 + $0xf0] sm:$0xff] }
 0x35d   :  { %3313 = vpow2.f32 %v2235_v35  ;;  %v3889_v35 = vpack.c.bf16 %v1329_v26, %v1326_v25 }
 0x35e   :  { %3315 = vpow2.f32 %v2236_v46  ;;  %v1328_v46 = vld [vmem:[#allocation8 + $0x108] sm:$0xff] }
 0x367   :  { %v3314_v55 = vpop.eup %3313 }
 0x368   :  { %v1038_v56 = vadd.f32 1.0, %v3314_v55  ;;  %v3316_v2 = vpop.eup %3315  ;;  %v1327_v55 = vld [vmem:[#allocation8 + $0x100] sm:$0xff] }
 0x369   :  { %v1045_v20 = vadd.f32 1.0, %v3316_v2  ;;  %v1330_v2 = vld [vmem:[#allocation8 + $0x118] sm:$0xff] }
 0x36a   :  { %3317 = vrcp.f32 %v1038_v56  ;;  %v3892_v56 = vpack.c.bf16 %v1328_v46, %v1325_v45 }
 0x374   :  { %v3318_v10 = vpop.eup %3317 }
 0x375   :  { %v1056_v13 = vmul.f32 %v3318_v10, %v1055_v4  ;;  %v1332_v4 = vld [vmem:[#allocation8 + $0x128] sm:$0xff]  ;;  %v1335_v10 = vld [vmem:[#allocation8 + $0x140] sm:$0xff] }
 0x377   :  { %v1057_v15 = vadd.f32 %v1056_v13, %v3734_v52  ;;  %v1296_v52 = vld [vmem:[#allocation8 + $0x8] sm:$0xff]  ;;  %v3896_v13 = vpack.c.bf16 %v1330_v2, %v1327_v55 }
 0x378   :  { %v3854_v39 = vpack.c.bf16 %v1299_v38, %v1296_v52  ;;  %v1341_v52 = vld [vmem:[#allocation8 + $0x170] sm:$0xff] }
 0x379   :  { %3319 = vtanh.f32 %v1057_v15  ;;  %v3898_v15 = vpack.c.bf16 %v1335_v10, %v1332_v4 }
 0x37a   :  { %3321 = vrcp.f32 %v1045_v20  ;;  %3026 = vmatprep.subr.bf16.mxu0 %v3854_v39  ;;  %v1331_v20 = vld [vmem:[#allocation8 + $0x120] sm:$0xff] }
 0x383   :  { %v3320_v23 = vpop.eup %3319 }
 0x384   :  { %v1059_v24 = vsub.f32 %v836_v37, %v3320_v23  ;;  %v3322_v30 = vpop.eup %3321  ;;  %v1321_v37 = vld [vmem:[#allocation8 + $0xd0] sm:$0xff] }
 0x385   :  { %v3887_v34 = vpack.c.bf16 %v1324_v18, %v1321_v37 }
 0x386   :  { %v1060_v33 = vmul.f32 %v3322_v30, %v1059_v24  ;;  %v1333_v24 = vld [vmem:[#allocation8 + $0x130] sm:$0xff]  ;;  %v1336_v30 = vld [vmem:[#allocation8 + $0x148] sm:$0xff] }
 0x388   :  { %v3840_v44 = vadd.f32 %v3320_v23, %v1060_v33  ;;  %v1334_v23 = vld [vmem:[#allocation8 + $0x138] sm:$0xff] }
 0x389   :  { %v1338_v33 = vld [vmem:[#allocation8 + $0x158] sm:$0xff]  ;;  %v3902_v38 = vpack.c.bf16 %v1334_v23, %v1331_v20  ;;  %v1528_v20 = vld [vmem:[#allocation8 + $0x40] sm:$0xff] }
 0x38a   :  { %1063 = vst [vmem:[#allocation9 + $0x10] sm:$0xff] %v3840_v44  ;;  %1183 = vmatmul.mubr.f32.vlgmr.msra.gmra.mrb[6].mxu0 %v3840_v44  ;;  %2595 = vmatmul.mubr.f32.vlgmr.msra.gmra.mrb[14].mxu1 %v3840_v44  ;;  %v1531_v23 = vld [vmem:[#allocation8 + $0x58] sm:$0xff] }
 0x38b   :  { %3059 = vmatpush3.bf16.msra.mxu1 %v3615_v41  ;;  %1407 = vmatprep.mubr.f32.mxu0 %v3498_v0  ;;  %v1295_v41 = vld [vmem:[#allocation8] sm:$0xff] }
 0x38c   :  { %3060 = vmatprep.subr.bf16.mxu1 %v3499_v40  ;;  %2629 = vmatprep.mubr.msk.f32.mxu1 %vm3500_vm0, %v3498_v0  ;;  %v3856_v48 = vpack.c.bf16 %v1298_v43, %v1295_v41  ;;  %v3906_v41 = vpack.c.bf16 %v1336_v30, %v1333_v24  ;;  %v3908_v43 = vpack.c.bf16 %v1341_v52, %v1338_v33  ;;  %v1534_v30 = vld [vmem:[#allocation8 + $0x70] sm:$0xff]  ;;  %v1537_v33 = vld [vmem:[#allocation8 + $0x88] sm:$0xff] }
 0x38d   :  { %v3956_v24 = vpack.c.bf16 %v1531_v23, %v1528_v20  ;;  %v3960_v52 = vpack.c.bf16 %v1537_v33, %v1534_v30 }
 0x38e   :  { %3028 = vmatpush1.bf16.msra.mxu0 %v3856_v48 }
 0x38f   :  { %3062 = vmatpush3.bf16.msra.mxu1 %v3625_v51  ;;  %v1305_v51 = vld [vmem:[#allocation8 + $0x50] sm:$0xff] }
 0x390   :  { %3063 = vmatprep.subr.bf16.mxu1 %v3499_v40  ;;  %v3860_v53 = vpack.c.bf16 %v1305_v51, %v1302_v50  ;;  %v1337_v50 = vld [vmem:[#allocation8 + $0x150] sm:$0xff]  ;;  %v1340_v51 = vld [vmem:[#allocation8 + $0x168] sm:$0xff] }
 0x391   :  { %v3912_v29 = vpack.c.bf16 %v1340_v51, %v1337_v50 }
 0x392   :  { %3030 = vmatprep.subr.bf16.mxu0 %v3860_v53 }
 0x393   :  { %3065 = vmatpush3.bf16.msra.mxu1 %v3636_v61  ;;  %v1304_v61 = vld [vmem:[#allocation8 + $0x48] sm:$0xff] }
 0x394   :  { %3066 = vmatprep.subr.bf16.mxu1 %v3499_v40  ;;  %v3862_v59 = vpack.c.bf16 %v1304_v61, %v1301_v57  ;;  %v1339_v57 = vld [vmem:[#allocation8 + $0x160] sm:$0xff]  ;;  %v1342_v61 = vld [vmem:[#allocation8 + $0x178] sm:$0xff] }
 0x395   :  { %v3916_v42 = vpack.c.bf16 %v1342_v61, %v1339_v57 }
 0x396   :  { %3032 = vmatpush1.bf16.msra.mxu0 %v3862_v59 }
 0x397   :  { %3034 = vmatprep.subr.bf16.mxu0 %v3866_v47  ;;  %3068 = vmatpush3.bf16.msra.mxu1 %v3877_v21 }
 0x398   :  { %3069 = vmatprep.subr.bf16.mxu1 %v3499_v40 }
 0x39a   :  { %3036 = vmatpush1.bf16.msra.mxu0 %v3868_v5 }
 0x39b   :  { %3038 = vmatprep.subr.bf16.mxu0 %v3872_v8  ;;  %3071 = vmatpush3.bf16.msra.mxu1 %v3887_v34 }
 0x39c   :  { %3072 = vmatprep.subr.bf16.mxu1 %v3499_v40 }
 0x39e   :  { %3040 = vmatpush1.bf16.msra.mxu0 %v3874_v16 }
 0x39f   :  { %3042 = vmatprep.subr.bf16.mxu0 %v3881_v31  ;;  %3074 = vmatpush3.bf16.msra.mxu1 %v3896_v13 }
 0x3a0   :  { %3075 = vmatprep.subr.bf16.mxu1 %v3499_v40 }
 0x3a2   :  { %3044 = vmatpush1.bf16.msra.mxu0 %v3884_v17 }
 0x3a3   :  { %3046 = vmatprep.subr.bf16.mxu0 %v3889_v35  ;;  %3077 = vmatpush3.bf16.msra.mxu1 %v3906_v41 }
 0x3a4   :  { %3078 = vmatprep.subr.bf16.mxu1 %v3499_v40 }
 0x3a6   :  { %3048 = vmatpush1.bf16.msra.mxu0 %v3892_v56 }
 0x3a7   :  { %3050 = vmatprep.subr.bf16.mxu0 %v3898_v15  ;;  %3080 = vmatpush3.bf16.msra.mxu1 %v3916_v42 }
 0x3a8   :  { %3113 = vmatprep.subr.bf16.mxu1 %v3499_v40 }
 0x3aa   :  { %3052 = vmatpush1.bf16.msra.mxu0 %v3902_v38 }
 0x3ab   :  { %3054 = vmatprep.subr.bf16.mxu0 %v3908_v43 }
 0x3ae   :  { %3056 = vmatpush1.bf16.msra.mxu0 %v3912_v29 }
 0x3af   :  { %3082 = vmatprep.subr.bf16.mxu0 %v3854_v39 }
 0x45d   :  { %v1184_v62 = vpop.f32.mrb[6].mxu0  ;;  %v1255_v1 = vpop.f32.mrb[14].mxu1 }
 0x45e   :  { %v3255_v6 = vadd.f32 %v1184_v62, %v3744_v3  ;;  %v1186_v7 = vpop.f32.mrb[7].mxu0  ;;  %v2596_v11 = vpop.f32.mrb[15].mxu1  ;;  %v1280_v36 = vadd.f32 %v3753_v28, %v1255_v1 }
 0x45f   :  { %v3256_v9 = vadd.f32 %v1186_v7, %v3747_v12 }
 0x460   :  { %v2238_v14 = vmul.f32 -1.442695, %v3255_v6 }
 0x461   :  { %v2239_v19 = vmul.f32 -1.442695, %v3256_v9 }
 0x462   :  { %3323 = vpow2.f32 %v2238_v14 }
 0x463   :  { %3325 = vpow2.f32 %v2239_v19 }
 0x46c   :  { %v3324_v22 = vpop.eup %3323 }
 0x46d   :  { %v1263_v27 = vadd.f32 1.0, %v3324_v22  ;;  %v3326_v32 = vpop.eup %3325 }
 0x46e   :  { %v1270_v26 = vadd.f32 1.0, %v3326_v32 }
 0x46f   :  { %3327 = vrcp.f32 %v1263_v27 }
 0x479   :  { %v3328_v37 = vpop.eup %3327 }
 0x47a   :  { %v1281_v18 = vmul.f32 %v3328_v37, %v1280_v36 }
 0x47c   :  { %v1282_v25 = vadd.f32 %v1281_v18, %v3732_v49  ;;  %v1522_v49 = vld [vmem:[#allocation8 + $0x10] sm:$0xff] }
 0x47e   :  { %3329 = vtanh.f32 %v1282_v25 }
 0x47f   :  { %3331 = vrcp.f32 %v1270_v26 }
 0x488   :  { %v3330_v45 = vpop.eup %3329 }
 0x489   :  { %v1284_v46 = vsub.f32 %v3840_v44, %v3330_v45  ;;  %v3332_v55 = vpop.eup %3331  ;;  %v1525_v44 = vld [vmem:[#allocation8 + $0x28] sm:$0xff] }
 0x48a   :  { %v3952_v10 = vpack.c.bf16 %v1525_v44, %v1522_v49 }
 0x48b   :  { %v1285_v2 = vmul.f32 %v3332_v55, %v1284_v46 }
 0x48d   :  { %v3928_v4 = vadd.f32 %v3330_v45, %v1285_v2 }
 0x48f   :  { %1288 = vst [vmem:[#allocation9 + $0x18] sm:$0xff] %v3928_v4  ;;  %1408 = vmatmul.mubr.f32.vlgmr.msra.gmra.mrb[8].mxu0 %v3928_v4  ;;  %2630 = vmatmul.mubr.f32.vlgmr.msra.gmra.mrb[16].mxu1 %v3928_v4 }
 0x490   :  { %3084 = vmatpush1.bf16.msra.mxu0 %v3856_v48  ;;  %1632 = vmatprep.mubr.f32.mxu0 %v3498_v0 }
 0x491   :  { %3086 = vmatprep.subr.bf16.mxu0 %v3860_v53  ;;  %2664 = vmatprep.mubr.msk.f32.mxu1 %vm3500_vm0, %v3498_v0 }
 0x492   :  { %3115 = vmatpush3.bf16.msra.mxu1 %v3952_v10 }
 0x493   :  { %3116 = vmatprep.subr.bf16.mxu1 %v3499_v40 }
 0x494   :  { %3088 = vmatpush1.bf16.msra.mxu0 %v3862_v59 }
 0x495   :  { %3090 = vmatprep.subr.bf16.mxu0 %v3866_v47 }
 0x496   :  { %3118 = vmatpush3.bf16.msra.mxu1 %v3956_v24 }
 0x497   :  { %3119 = vmatprep.subr.bf16.mxu1 %v3499_v40 }
 0x498   :  { %3092 = vmatpush1.bf16.msra.mxu0 %v3868_v5 }
 0x499   :  { %3094 = vmatprep.subr.bf16.mxu0 %v3872_v8 }
 0x49a   :  { %3121 = vmatpush3.bf16.msra.mxu1 %v3960_v52 }
 0x49b   :  { %3122 = vmatprep.subr.bf16.mxu1 %v3499_v40 }
 0x49c   :  { %3096 = vmatpush1.bf16.msra.mxu0 %v3874_v16 }
 0x49d   :  { %3098 = vmatprep.subr.bf16.mxu0 %v3881_v31 }
 0x49e   :  { %3124 = vmatpush3.bf16.msra.mxu1 %v3877_v21 }
 0x49f   :  { %3125 = vmatprep.subr.bf16.mxu1 %v3499_v40 }
 0x4a0   :  { %3100 = vmatpush1.bf16.msra.mxu0 %v3884_v17 }
 0x4a1   :  { %3102 = vmatprep.subr.bf16.mxu0 %v3889_v35 }
 0x4a2   :  { %3127 = vmatpush3.bf16.msra.mxu1 %v3887_v34 }
 0x4a3   :  { %3128 = vmatprep.subr.bf16.mxu1 %v3499_v40 }
 0x4a4   :  { %3104 = vmatpush1.bf16.msra.mxu0 %v3892_v56 }
 0x4a5   :  { %3106 = vmatprep.subr.bf16.mxu0 %v3898_v15 }
 0x4a6   :  { %3130 = vmatpush3.bf16.msra.mxu1 %v3896_v13 }
 0x4a7   :  { %3131 = vmatprep.subr.bf16.mxu1 %v3499_v40 }
 0x4a8   :  { %3108 = vmatpush1.bf16.msra.mxu0 %v3902_v38 }
 0x4a9   :  { %3110 = vmatprep.subr.bf16.mxu0 %v3908_v43 }
 0x4aa   :  { %3133 = vmatpush3.bf16.msra.mxu1 %v3906_v41 }
 0x4ab   :  { %3134 = vmatprep.subr.bf16.mxu1 %v3499_v40 }
 0x4ac   :  { %3112 = vmatpush1.bf16.msra.mxu0 %v3912_v29 }
 0x4ad   :  { %3138 = vmatprep.subr.bf16.mxu0 %v3854_v39 }
 0x4ae   :  { %3136 = vmatpush3.bf16.msra.mxu1 %v3916_v42 }
 0x4af   :  { %3169 = vmatprep.subr.bf16.mxu1 %v3499_v40 }
 0x562   :  { %v1409_v50 = vpop.f32.mrb[8].mxu0  ;;  %v1480_v51 = vpop.f32.mrb[16].mxu1 }
 0x563   :  { %v3257_v57 = vadd.f32 %v1409_v50, %v3744_v3  ;;  %v1411_v61 = vpop.f32.mrb[9].mxu0  ;;  %v2631_v62 = vpop.f32.mrb[17].mxu1  ;;  %v1505_v19 = vadd.f32 %v3753_v28, %v1480_v51 }
 0x564   :  { %v3258_v6 = vadd.f32 %v1411_v61, %v3747_v12 }
 0x565   :  { %v2241_v1 = vmul.f32 -1.442695, %v3257_v57 }
 0x566   :  { %v2242_v7 = vmul.f32 -1.442695, %v3258_v6 }
 0x567   :  { %3333 = vpow2.f32 %v2241_v1 }
 0x568   :  { %3335 = vpow2.f32 %v2242_v7 }
 0x571   :  { %v3334_v11 = vpop.eup %3333 }
 0x572   :  { %v1488_v14 = vadd.f32 1.0, %v3334_v11  ;;  %v3336_v9 = vpop.eup %3335 }
 0x573   :  { %v1495_v36 = vadd.f32 1.0, %v3336_v9 }
 0x574   :  { %3337 = vrcp.f32 %v1488_v14 }
 0x57e   :  { %v3338_v22 = vpop.eup %3337 }
 0x57f   :  { %v1506_v27 = vmul.f32 %v3338_v22, %v1505_v19 }
 0x581   :  { %v1507_v32 = vadd.f32 %v1506_v27, %v3738_v58 }
 0x583   :  { %3339 = vtanh.f32 %v1507_v32 }
 0x584   :  { %3341 = vrcp.f32 %v1495_v36 }
 0x58d   :  { %v3340_v37 = vpop.eup %3339 }
 0x58e   :  { %v1509_v18 = vsub.f32 %v3928_v4, %v3340_v37  ;;  %v3342_v25 = vpop.eup %3341 }
 0x590   :  { %v1510_v26 = vmul.f32 %v3342_v25, %v1509_v18 }
 0x592   :  { %v3979_v45 = vadd.f32 %v3340_v37, %v1510_v26 }
 0x594   :  { %1513 = vst [vmem:[#allocation9 + $0x20] sm:$0xff] %v3979_v45  ;;  %1633 = vmatmul.mubr.f32.vlgmr.msra.gmra.mrb[10].mxu0 %v3979_v45  ;;  %2665 = vmatmul.mubr.f32.vlgmr.msra.gmra.mrb[18].mxu1 %v3979_v45 }
 0x595   :  { %3140 = vmatpush1.bf16.msra.mxu0 %v3856_v48  ;;  %3171 = vmatpush3.bf16.msra.mxu1 %v3952_v10 }
 0x596   :  { %3142 = vmatprep.subr.bf16.mxu0 %v3860_v53  ;;  %3172 = vmatprep.subr.bf16.mxu1 %v3499_v40 }
 0x597   :  { %1857 = vmatprep.mubr.f32.mxu0 %v3498_v0  ;;  %2699 = vmatprep.mubr.msk.f32.mxu1 %vm3500_vm0, %v3498_v0 }
 0x599   :  { %3144 = vmatpush1.bf16.msra.mxu0 %v3862_v59  ;;  %3174 = vmatpush3.bf16.msra.mxu1 %v3956_v24 }
 0x59a   :  { %3146 = vmatprep.subr.bf16.mxu0 %v3866_v47  ;;  %3175 = vmatprep.subr.bf16.mxu1 %v3499_v40 }
 0x59d   :  { %3148 = vmatpush1.bf16.msra.mxu0 %v3868_v5  ;;  %3177 = vmatpush3.bf16.msra.mxu1 %v3960_v52 }
 0x59e   :  { %3150 = vmatprep.subr.bf16.mxu0 %v3872_v8  ;;  %3178 = vmatprep.subr.bf16.mxu1 %v3499_v40 }
 0x5a1   :  { %3152 = vmatpush1.bf16.msra.mxu0 %v3874_v16  ;;  %3180 = vmatpush3.bf16.msra.mxu1 %v3877_v21 }
 0x5a2   :  { %3154 = vmatprep.subr.bf16.mxu0 %v3881_v31  ;;  %3181 = vmatprep.subr.bf16.mxu1 %v3499_v40 }
 0x5a5   :  { %3156 = vmatpush1.bf16.msra.mxu0 %v3884_v17  ;;  %3183 = vmatpush3.bf16.msra.mxu1 %v3887_v34 }
 0x5a6   :  { %3158 = vmatprep.subr.bf16.mxu0 %v3889_v35  ;;  %3184 = vmatprep.subr.bf16.mxu1 %v3499_v40 }
 0x5a9   :  { %3160 = vmatpush1.bf16.msra.mxu0 %v3892_v56  ;;  %3186 = vmatpush3.bf16.msra.mxu1 %v3896_v13 }
 0x5aa   :  { %3162 = vmatprep.subr.bf16.mxu0 %v3898_v15  ;;  %3187 = vmatprep.subr.bf16.mxu1 %v3499_v40 }
 0x5ad   :  { %3164 = vmatpush1.bf16.msra.mxu0 %v3902_v38  ;;  %3189 = vmatpush3.bf16.msra.mxu1 %v3906_v41 }
 0x5ae   :  { %3166 = vmatprep.subr.bf16.mxu0 %v3908_v43  ;;  %3190 = vmatprep.subr.bf16.mxu1 %v3499_v40 }
 0x5b1   :  { %3168 = vmatpush1.bf16.msra.mxu0 %v3912_v29  ;;  %3192 = vmatpush3.bf16.msra.mxu1 %v3916_v42 }
 0x5b2   :  { %3194 = vmatprep.subr.bf16.mxu0 %v3854_v39  ;;  %3225 = vmatprep.subr.bf16.mxu1 %v3499_v40  ;;  %v4024_v39 = vld [vmem:[%s4101_s4] ss:$0 sm:$0xff]  ;;  %s3501_s4 = smov [#allocation9]  }
 0x5b3   :  { %s2195_s21 = sshll.u32 %s3501_s4, 4  ;;  %s2196_s21 = int_to_ptr.vmem [resolvable:$true] %s2195_s21 }
 0x5b4   :  { %s3439_s24 = scalar_lea.vmem %s2196_s21, 1024  ;;  %p3444_p11 = scmp.lt.s32.totalorder %s2196_s21, %s2196_s21 }
 0x5b5   :  { %p3440_p10 = scmp.ne.s32.totalorder %s2196_s21, %s3439_s24  ;;  %p3445_p12 = scmp.lt.s32.totalorder %s3439_s24, %s3439_s24 }
 0x5b7   :  { %p3446_p13 = por %p3445_p12, %p3444_p11 }
 0x5b9   :  { %p3447_p0 = pnand %p3446_p13, %p3440_p10 }
 0x667   :  { %v1634_v58 = vpop.f32.mrb[10].mxu0  ;;  %v1705_v28 = vpop.f32.mrb[18].mxu1 }
 0x668   :  { %v3259_v46 = vadd.f32 %v1634_v58, %v3744_v3  ;;  %v1636_v55 = vpop.f32.mrb[11].mxu0  ;;  %v2666_v2 = vpop.f32.mrb[19].mxu1  ;;  %v1730_v33 = vadd.f32 %v4024_v39, %v1705_v28 }
 0x669   :  { %v3260_v49 = vadd.f32 %v1636_v55, %v3747_v12 }
 0x66a   :  { %v2244_v4 = vmul.f32 -1.442695, %v3259_v46 }
 0x66b   :  { %v2245_v44 = vmul.f32 -1.442695, %v3260_v49 }
 0x66c   :  { %3343 = vpow2.f32 %v2244_v4 }
 0x66d   :  { %3345 = vpow2.f32 %v2245_v44 }
 0x676   :  { %v3344_v20 = vpop.eup %3343 }
 0x677   :  { %v1713_v23 = vadd.f32 1.0, %v3344_v20  ;;  %v3346_v30 = vpop.eup %3345 }
 0x678   :  { %v1720_v61 = vadd.f32 1.0, %v3346_v30 }
 0x679   :  { %3347 = vrcp.f32 %v1713_v23 }
 0x683   :  { %v3348_v50 = vpop.eup %3347 }
 0x684   :  { %v1731_v51 = vmul.f32 %v3348_v50, %v1730_v33 }
 0x686   :  { %v1732_v57 = vadd.f32 %v1731_v51, %v3736_v54 }
 0x688   :  { %3349 = vtanh.f32 %v1732_v57 }
 0x689   :  { %3351 = vrcp.f32 %v1720_v61 }
 0x692   :  { %v3350_v62 = vpop.eup %3349 }
 0x693   :  { %v1734_v1 = vsub.f32 %v3979_v45, %v3350_v62  ;;  %v3352_v6 = vpop.eup %3351 }
 0x695   :  { %v1735_v7 = vmul.f32 %v3352_v6, %v1734_v1 }
 0x697   :  { %v1736_v11 = vadd.f32 %v3350_v62, %v1735_v7 }
 0x699   :  { %1738 = vst [vmem:[#allocation9 + $0x28] sm:$0xff] %v1736_v11  ;;  %1858 = vmatmul.mubr.f32.vlgmr.msra.gmra.mrb[12].mxu0 %v1736_v11  ;;  %2700 = vmatmul.mubr.f32.vlgmr.msra.gmra.mrb[20].mxu1 %v1736_v11 }
 0x69a   :  { %3196 = vmatpush1.bf16.msra.mxu0 %v3856_v48  ;;  %3227 = vmatpush3.bf16.msra.mxu1 %v3952_v10 }
 0x69b   :  { %3198 = vmatprep.subr.bf16.mxu0 %v3860_v53  ;;  %3228 = vmatprep.subr.bf16.mxu1 %v3499_v40 }
 0x69c   :  { %2082 = vmatprep.mubr.f32.mxu0 %v3498_v0  ;;  %2734 = vmatprep.mubr.msk.f32.mxu1 %vm3500_vm0, %v3498_v0 }
 0x69e   :  { %3200 = vmatpush1.bf16.msra.mxu0 %v3862_v59  ;;  %3230 = vmatpush3.bf16.msra.mxu1 %v3956_v24 }
 0x69f   :  { %3202 = vmatprep.subr.bf16.mxu0 %v3866_v47  ;;  %3231 = vmatprep.subr.bf16.mxu1 %v3499_v40 }
 0x6a2   :  { %3204 = vmatpush1.bf16.msra.mxu0 %v3868_v5  ;;  %3233 = vmatpush3.bf16.msra.mxu1 %v3960_v52 }
 0x6a3   :  { %3206 = vmatprep.subr.bf16.mxu0 %v3872_v8  ;;  %3234 = vmatprep.subr.bf16.mxu1 %v3499_v40 }
 0x6a6   :  { %3208 = vmatpush1.bf16.msra.mxu0 %v3874_v16  ;;  %3236 = vmatpush3.bf16.msra.mxu1 %v3877_v21 }
 0x6a7   :  { %3210 = vmatprep.subr.bf16.mxu0 %v3881_v31  ;;  %3237 = vmatprep.subr.bf16.mxu1 %v3499_v40 }
 0x6aa   :  { %3212 = vmatpush1.bf16.msra.mxu0 %v3884_v17  ;;  %3239 = vmatpush3.bf16.msra.mxu1 %v3887_v34 }
 0x6ab   :  { %3214 = vmatprep.subr.bf16.mxu0 %v3889_v35  ;;  %3240 = vmatprep.subr.bf16.mxu1 %v3499_v40 }
 0x6ae   :  { %3216 = vmatpush1.bf16.msra.mxu0 %v3892_v56  ;;  %3242 = vmatpush3.bf16.msra.mxu1 %v3896_v13 }
 0x6af   :  { %3218 = vmatprep.subr.bf16.mxu0 %v3898_v15  ;;  %3243 = vmatprep.subr.bf16.mxu1 %v3499_v40 }
 0x6b2   :  { %3220 = vmatpush1.bf16.msra.mxu0 %v3902_v38  ;;  %3245 = vmatpush3.bf16.msra.mxu1 %v3906_v41 }
 0x6b3   :  { %3222 = vmatprep.subr.bf16.mxu0 %v3908_v43  ;;  %3246 = vmatprep.subr.bf16.mxu1 %v3499_v40 }
 0x6b6   :  { %3224 = vmatpush1.bf16.msra.mxu0 %v3912_v29  ;;  %3248 = vmatpush3.bf16.msra.mxu1 %v3916_v42 }
 0x76c   :  { %v1859_v0 = vpop.f32.mrb[12].mxu0  ;;  %v1930_v54 = vpop.f32.mrb[20].mxu1 }
 0x76d   :  { %v3261_v48 = vadd.f32 %v1859_v0, %v3744_v3  ;;  %v1861_v53 = vpop.f32.mrb[13].mxu0  ;;  %v2701_v59 = vpop.f32.mrb[21].mxu1  ;;  %v1955_v31 = vadd.f32 %v4024_v39, %v1930_v54 }
 0x76e   :  { %v3262_v5 = vadd.f32 %v1861_v53, %v3747_v12 }
 0x76f   :  { %v2247_v47 = vmul.f32 -1.442695, %v3261_v48 }
 0x770   :  { %v2248_v8 = vmul.f32 -1.442695, %v3262_v5 }
 0x771   :  { %3353 = vpow2.f32 %v2247_v47 }
 0x772   :  { %3355 = vpow2.f32 %v2248_v8 }
 0x77b   :  { %v3354_v16 = vpop.eup %3353 }
 0x77c   :  { %v1938_v21 = vadd.f32 1.0, %v3354_v16  ;;  %v3356_v40 = vpop.eup %3355 }
 0x77d   :  { %v1945_v56 = vadd.f32 1.0, %v3356_v40 }
 0x77e   :  { %3357 = vrcp.f32 %v1938_v21 }
 0x788   :  { %v3358_v17 = vpop.eup %3357 }
 0x789   :  { %v1956_v34 = vmul.f32 %v3358_v17, %v1955_v31 }
 0x78b   :  { %v1957_v35 = vadd.f32 %v1956_v34, %v3742_v63 }
 0x78d   :  { %3359 = vtanh.f32 %v1957_v35 }
 0x78e   :  { %3361 = vrcp.f32 %v1945_v56 }
 0x797   :  { %v3360_v13 = vpop.eup %3359 }
 0x798   :  { %v1959_v15 = vsub.f32 %v1736_v11, %v3360_v13  ;;  %v3362_v38 = vpop.eup %3361 }
 0x79a   :  { %v1960_v41 = vmul.f32 %v3362_v38, %v1959_v15 }
 0x79c   :  { %v1961_v43 = vadd.f32 %v3360_v13, %v1960_v41 }
 0x79e   :  { %1963 = vst [vmem:[#allocation9 + $0x30] sm:$0xff] %v1961_v43  ;;  %2083 = vmatmul.mubr.f32.vlgmr.msra.gmra.mrb[14].mxu0 %v1961_v43  ;;  %2735 = vmatmul.mubr.f32.vlgmr.msra.gmra.mrb[22].mxu1 %v1961_v43 }
 0x871   :  { %v2084_v29 = vpop.f32.mrb[14].mxu0  ;;  %v2155_v42 = vpop.f32.mrb[22].mxu1 }
 0x872   :  { %v3263_v10 = vadd.f32 %v2084_v29, %v3744_v3  ;;  %v2086_v24 = vpop.f32.mrb[15].mxu0  ;;  %v2736_v52 = vpop.f32.mrb[23].mxu1  ;;  %v2180_v32 = vadd.f32 %v4024_v39, %v2155_v42 }
 0x873   :  { %v3264_v63 = vadd.f32 %v2086_v24, %v3747_v12 }
 0x874   :  { %v2250_v14 = vmul.f32 -1.442695, %v3263_v10 }
 0x875   :  { %v2251_v9 = vmul.f32 -1.442695, %v3264_v63 }
 0x876   :  { %3363 = vpow2.f32 %v2250_v14 }
 0x877   :  { %3365 = vpow2.f32 %v2251_v9 }
 0x880   :  { %v3364_v19 = vpop.eup %3363 }
 0x881   :  { %v2163_v22 = vadd.f32 1.0, %v3364_v19  ;;  %v3366_v27 = vpop.eup %3365 }
 0x882   :  { %v2170_v25 = vadd.f32 1.0, %v3366_v27 }
 0x883   :  { %3367 = vrcp.f32 %v2163_v22 }
 0x88d   :  { %v3368_v36 = vpop.eup %3367 }
 0x88e   :  { %v2181_v37 = vmul.f32 %v3368_v36, %v2180_v32 }
 0x890   :  { %v2182_v18 = vadd.f32 %v2181_v37, %v3740_v60 }
 0x892   :  { %3369 = vtanh.f32 %v2182_v18 }
 0x893   :  { %3371 = vrcp.f32 %v2170_v25 }
 0x89c   :  { %v3370_v3 = vpop.eup %3369 }
 0x89d   :  { %v2184_v26 = vsub.f32 %v1961_v43, %v3370_v3  ;;  %v3372_v45 = vpop.eup %3371 }
 0x89f   :  { %v2185_v12 = vmul.f32 %v3372_v45, %v2184_v26 }
 0x8a1   :  { %v2186_v58 = vadd.f32 %v3370_v3, %v2185_v12 }
 0x8a3   :  { %2188 = vst [vmem:[#allocation9 + $0x38] sm:$0xff] %v2186_v58  ;;  %2189 = vst [vmem:[#allocation10] sm:$0xff] %v2186_v58 }
 0x8a4   :  { %3450 = shalt.err (!%p3447_p0)
}
 0x8a5   :  { %s3451_s28 = scalar_lea.hbm %s4103_s6, 1024 }
 0x8a6   :  { %p3452_p1 = scmp.ne.s32.totalorder %s4103_s6, %s3451_s28  ;;  %p3455_p2 = scmp.lt.u32.totalorder %s3451_s28, %s4103_s6 }
 0x8a8   :  { %p3457_p3 = pnand %p3455_p2, %p3452_p1 }
 0x8aa   :  { %3460 = shalt.err (!%p3457_p3)
}
 0x8ab   :  { %2201 = dma.vmem_to_hbm [thread:$0]  %s2196_s21, 1024, %s4103_s6, [#allocation5], %s3495_s1, %s3495_s1, %s3496_s25  }
 0x8ac   :  { %s3461_s14 = scalar_lea.vmem %s2209_s23, 128  ;;  %p3466_p5 = scmp.lt.s32.totalorder %s2209_s23, %s2209_s23 }
 0x8ad   :  { %p3462_p4 = scmp.ne.s32.totalorder %s2209_s23, %s3461_s14  ;;  %p3467_p6 = scmp.lt.s32.totalorder %s3461_s14, %s3461_s14 }
 0x8af   :  { %p3468_p7 = por %p3467_p6, %p3466_p5 }
 0x8b1   :  { %p3469_p8 = pnand %p3468_p7, %p3462_p4 }
 0x8b3   :  { %3472 = shalt.err (!%p3469_p8)
}
 0x8b4   :  { %s3473_s0 = scalar_lea.hbm %s4104_s7, 128 }
 0x8b5   :  { %p3474_p9 = scmp.ne.s32.totalorder %s4104_s7, %s3473_s0  ;;  %p3477_p10 = scmp.lt.u32.totalorder %s3473_s0, %s4104_s7 }
 0x8b7   :  { %p3479_p11 = pnand %p3477_p10, %p3474_p9 }
 0x8b9   :  { %3482 = shalt.err (!%p3479_p11)
}
 0x8ba   :  { %2211 = dma.vmem_to_hbm [thread:$0]  %s2209_s23, 128, %s4104_s7, [#allocation11]  }
 0x8bb   :  { %3487 = dma.done.wait [#allocation5], 1024  }
 0x8bc   :  { %3488 = vsyncadd [#allocation5], 4294966272 }
 0x8bd   :  { %3489 = dma.done.wait [#allocation11], 128  }
 0x8be   :  { %3490 = vsyncadd [#allocation11], 4294967168 }
 0x8bf   :  { %2218 = vsyncpa [#allocation4], 1 }
 0x8c0   :  { %2219 = vsyncpa [#allocation7], 1 }
 0x8c1   :  { %2220 = vsyncpa [#allocation5], 1 }
 0x8c2   :  { %2221 = vsyncpa [#allocation11], 1 }

</bundles_post_ra>
